<compile_context>
chip_gen: v5e
topology: v5e:2x2
jax: 0.10.0
libtpu: 0.0.40
codegen_flags: <defaults>
</compile_context>

<pallas_src>
import math

import jax
import jax.numpy as jnp
from jax.experimental import pallas as pl
from jax.experimental.pallas import tpu as pltpu

_S = 7             # 7x7 grid (fixed by the loss definition: range(7))
_GX = 7.0          # num_gridx
_GY = 7.0          # num_gridy
_NCH = 30          # 5*2 bbox channels + 20 class channels
_NCH_PAD = 32      # channel (sublane) axis padded to a multiple of 8
_TILE = 512        # lane tile (multiple of 128; 512-2048 amortizes DMA well)


def _iou(b1, b2):
    """Vectorized, branchless translation of `calculate_iou`."""
    x11, y11, x12, y12 = b1
    x21, y21, x22, y22 = b2
    no_overlap = (x12 < x21) | (x11 > x22) | (y12 < y21) | (y11 > y22)
    ix1 = jnp.maximum(x11, x21)
    iy1 = jnp.maximum(y11, y21)
    ix2 = jnp.minimum(x12, x22)
    iy2 = jnp.minimum(y12, y22)
    area1 = (x12 - x11) * (y12 - y11)
    area2 = (x22 - x21) * (y22 - y21)
    area_i = jnp.where(no_overlap, 0.0, (ix2 - ix1) * (iy2 - iy1))
    denom = area1 + area2 - area_i
    return jnp.where(area_i > 0.0, area_i / denom, 0.0)


def _yolo_cell_loss_kernel(p_ref, l_ref, m_ref, n_ref, out_ref):
    """Per-cell YOLOv1 loss term for a tile of (batch, m, n) cells.

    p_ref, l_ref : (32, TILE) float32 VMEM tiles (channels x cells).
    m_ref, n_ref : (1, TILE)  float32 grid coordinates of each cell.
    out_ref      : (1, TILE)  float32 per-cell loss contribution.
    """
    p = p_ref[...]       # (32, TILE)
    lab = l_ref[...]     # (32, TILE)
    m = m_ref[...]       # (1, TILE)
    n = n_ref[...]       # (1, TILE)

    def make_bbox(a, c0):
        cx = (a[c0:c0 + 1, :] + m) / _GX
        cy = (a[c0 + 1:c0 + 2, :] + n) / _GY
        w2 = a[c0 + 2:c0 + 3, :] * 0.5
        h2 = a[c0 + 3:c0 + 4, :] * 0.5
        return (cx - w2, cy - h2, cx + w2, cy + h2)

    bbox1 = make_bbox(p, 0)        # predicted box 1
    bbox2 = make_bbox(p, 5)        # predicted box 2
    bboxg = make_bbox(lab, 0)      # ground-truth box
    iou1 = _iou(bbox1, bboxg)      # (1, TILE)
    iou2 = _iou(bbox2, bboxg)      # (1, TILE)

    resp1 = iou1 >= iou2           # box 1 responsible?

    # Select the responsible box BEFORE the heavy coordinate math
    # (halves the sqrt / square-difference work vs computing both branches).
    rp = jnp.where(resp1, p[0:4, :], p[5:9, :])       # (4, TILE)
    rl = jnp.where(resp1, lab[0:4, :], lab[5:9, :])   # (4, TILE)
    d_xy = jnp.sum((rp[0:2, :] - rl[0:2, :]) ** 2, axis=0, keepdims=True)
    d_wh = jnp.sum((jnp.sqrt(rp[2:4, :]) - jnp.sqrt(rl[2:4, :])) ** 2,
                   axis=0, keepdims=True)
    coor_loss = 5.0 * (d_xy + d_wh)

    p4 = p[4:5, :]
    p9 = p[9:10, :]
    d4 = (p4 - iou1) ** 2
    d9 = (p9 - iou2) ** 2
    obj_conf = jnp.where(resp1, d4, d9)
    noobj_conf = 0.5 * jnp.where(resp1, d9, d4)

    # 20-class SSE; axis-0 reduce lands on the XLU (free slot when VALU-bound).
    class_loss = jnp.sum((p[10:_NCH, :] - lab[10:_NCH, :]) ** 2,
                         axis=0, keepdims=True)

    obj_cell_loss = coor_loss + obj_conf + noobj_conf + class_loss
    noobj_cell_loss = 0.5 * (p4 * p4 + p9 * p9)

    has_obj = lab[4:5, :] == 1.0   # exact equality, as in the reference
    out_ref[...] = jnp.where(has_obj, obj_cell_loss, noobj_cell_loss)


def yolov1_per_cell_loss(pred, labels):
    """Returns (B, 7, 7) per-cell loss terms, computed inside the Pallas kernel."""
    assert pred.shape == labels.shape
    b, c, h, w = pred.shape
    assert (c, h, w) == (_NCH, _S, _S)
    n_cells = b * _S * _S
    n_pad = _TILE * ((n_cells + _TILE - 1) // _TILE)   # lane-dense padding
    n_tiles = n_pad // _TILE

    # NCHW -> (30, B*49): channels on sublanes, flattened cells on lanes.
    # TODO(synk): if the producing network can emit channels-last / (30, B*49)
    # directly, this relayout (an extra HBM round trip) should be dropped.
    p2 = jnp.transpose(pred.reshape(b, _NCH, _S * _S), (1, 0, 2))
    p2 = p2.reshape(_NCH, n_cells).astype(jnp.float32)
    l2 = jnp.transpose(labels.reshape(b, _NCH, _S * _S), (1, 0, 2))
    l2 = l2.reshape(_NCH, n_cells).astype(jnp.float32)

    # Pad channels 30 -> 32 (full sublane tiles) and lanes to a tile multiple.
    p2 = jnp.pad(p2, ((0, _NCH_PAD - _NCH), (0, n_pad - n_cells)))
    l2 = jnp.pad(l2, ((0, _NCH_PAD - _NCH), (0, n_pad - n_cells)))

    # Precomputed (m, n) grid coordinates of each flattened cell
    # (cell = i*49 + m*7 + n) -> no integer div/mod inside the kernel.
    m_base = jnp.repeat(jnp.arange(_S, dtype=jnp.float32), _S)   # m varies slow
    n_base = jnp.tile(jnp.arange(_S, dtype=jnp.float32), _S)     # n varies fast
    m_grid = jnp.pad(jnp.tile(m_base, b), (0, n_pad - n_cells)).reshape(1, n_pad)
    n_grid = jnp.pad(jnp.tile(n_base, b), (0, n_pad - n_cells)).reshape(1, n_pad)

    out = pl.pallas_call(
        _yolo_cell_loss_kernel,
        out_shape=jax.ShapeDtypeStruct((1, n_pad), jnp.float32),
        grid=(n_tiles,),
        in_specs=[
            pl.BlockSpec((_NCH_PAD, _TILE), lambda i: (0, i)),
            pl.BlockSpec((_NCH_PAD, _TILE), lambda i: (0, i)),
            pl.BlockSpec((1, _TILE), lambda i: (0, i)),
            pl.BlockSpec((1, _TILE), lambda i: (0, i)),
        ],
        out_specs=pl.BlockSpec((1, _TILE), lambda i: (0, i)),
        compiler_params=pltpu.CompilerParams(
            dimension_semantics=("parallel",)),
    )(p2, l2, m_grid, n_grid)

    return out[:, :n_cells].reshape(b, _S, _S)


def loss_yolov1_forward(pred, labels):
    """Exact equivalent of Loss_yolov1.forward(pred, labels).

    The PyTorch reference returns from inside the innermost grid loop, so
    only cell (i=0, m=0, n=0) contributes; loss is that term / n_batch.
    """
    per_cell = yolov1_per_cell_loss(pred, labels)
    n_batch = pred.shape[0]
    return per_cell[0, 0, 0] / n_batch


# ---------- pure-Python reference (mirrors the PyTorch code exactly) ----------
def _ref_calculate_iou(b1, b2):
    inter = [0.0, 0.0, 0.0, 0.0]
    if b1[2] < b2[0] or b1[0] > b2[2] or b1[3] < b2[1] or (b1[1] > b2[3]):
        pass
    else:
        inter = [max(b1[0], b2[0]), max(b1[1], b2[1]),
                 min(b1[2], b2[2]), min(b1[3], b2[3])]
    a1 = (b1[2] - b1[0]) * (b1[3] - b1[1])
    a2 = (b2[2] - b2[0]) * (b2[3] - b2[1])
    ai = (inter[2] - inter[0]) * (inter[3] - inter[1])
    return ai / (a1 + a2 - ai) if ai > 0 else 0.0


def _ref_forward(pred, labels):
    import numpy as np
    pred = np.asarray(pred, dtype=np.float64)
    labels = np.asarray(labels, dtype=np.float64)
    gx = gy = _S
    nb = pred.shape[0]
    i, m, n = 0, 0, 0  # early return in the reference -> only this cell
    if labels[i, 4, m, n] == 1:
        b1 = ((pred[i, 0, m, n] + m) / gx - pred[i, 2, m, n] / 2,
              (pred[i, 1, m, n] + n) / gy - pred[i, 3, m, n] / 2,
              (pred[i, 0, m, n] + m) / gx + pred[i, 2, m, n] / 2,
              (pred[i, 1, m, n] + n) / gy + pred[i, 3, m, n] / 2)
        b2 = ((pred[i, 5, m, n] + m) / gx - pred[i, 7, m, n] / 2,
              (pred[i, 6, m, n] + n) / gy - pred[i, 8, m, n] / 2,
              (pred[i, 5, m, n] + m) / gx + pred[i, 7, m, n] / 2,
              (pred[i, 6, m, n] + n) / gy + pred[i, 8, m, n] / 2)
        bg = ((labels[i, 0, m, n] + m) / gx - labels[i, 2, m, n] / 2,
              (labels[i, 1, m, n] + n) / gy - labels[i, 3, m, n] / 2,
              (labels[i, 0, m, n] + m) / gx + labels[i, 2, m, n] / 2,
              (labels[i, 1, m, n] + n) / gy + labels[i, 3, m, n] / 2)
        iou1 = _ref_calculate_iou(b1, bg)
        iou2 = _ref_calculate_iou(b2, bg)
        if iou1 >= iou2:
            coor = 5 * (((pred[i, 0:2, m, n] - labels[i, 0:2, m, n]) ** 2).sum()
                        + ((np.sqrt(pred[i, 2:4, m, n]) - np.sqrt(labels[i, 2:4, m, n])) ** 2).sum())
            obj = (pred[i, 4, m, n] - iou1) ** 2
            noobj = 0.5 * (pred[i, 9, m, n] - iou2) ** 2
        else:
            coor = 5 * (((pred[i, 5:7, m, n] - labels[i, 5:7, m, n]) ** 2).sum()
                        + ((np.sqrt(pred[i, 7:9, m, n]) - np.sqrt(labels[i, 7:9, m, n])) ** 2).sum())
            obj = (pred[i, 9, m, n] - iou2) ** 2
            noobj = 0.5 * (pred[i, 4, m, n] - iou1) ** 2
        cls = ((pred[i, 10:, m, n] - labels[i, 10:, m, n]) ** 2).sum()
        loss = coor + obj + noobj + cls
    else:
        loss = 0.5 * (pred[i, 4, m, n] ** 2 + pred[i, 9, m, n] ** 2)
    return loss / nb


if __name__ == "__main__":
    B = 2
    key = jax.random.PRNGKey(0)
    k_pred, k_lab, k_obj = jax.random.split(key, 3)

    # Keep width/height channels positive (the loss takes sqrt of them).
    pred = jax.random.uniform(k_pred, (B, _NCH, _S, _S), jnp.float32, 0.05, 1.0)
    labels = jax.random.uniform(k_lab, (B, _NCH, _S, _S), jnp.float32, 0.05, 1.0)
    obj_mask = (jax.random.uniform(k_obj, (B, _S, _S)) > 0.5).astype(jnp.float32)
    labels = labels.at[:, 4].set(obj_mask)
    labels = labels.at[0, 4, 0, 0].set(1.0)  # exercise the object branch at cell (0,0,0)

    loss = jax.jit(loss_yolov1_forward)(pred, labels)
    loss = jax.block_until_ready(loss)

    ref = _ref_forward(pred, labels)
    assert math.isfinite(float(loss))
    assert abs(float(loss) - float(ref)) <= 1e-4 * max(1.0, abs(float(ref))), (loss, ref)

    print("KERNEL_OK")
</pallas_src>

<mosaic_0001>
module attributes {stable_mosaic.version = 11 : i64} {
  func.func @_yolo_cell_loss_kernel(%arg0: i32, %arg1: memref<32x512xf32, #tpu.memory_space<vmem>>, %arg2: memref<32x512xf32, #tpu.memory_space<vmem>>, %arg3: memref<1x512xf32, #tpu.memory_space<vmem>>, %arg4: memref<1x512xf32, #tpu.memory_space<vmem>>, %arg5: memref<1x512xf32, #tpu.memory_space<vmem>>) attributes {dimension_semantics = [#tpu.dimension_semantics<parallel>], iteration_bounds = array<i64: 1>, scalar_prefetch = 0 : i64, scratch_operands = 0 : i64, tpu.core_type = #tpu.core_type<tc>, window_params = [{transform_indices = @transform_0, window_bounds = array<i64: 32, 512>}, {transform_indices = @transform_1, window_bounds = array<i64: 32, 512>}, {transform_indices = @transform_2, window_bounds = array<i64: 1, 512>}, {transform_indices = @transform_3, window_bounds = array<i64: 1, 512>}, {transform_indices = @transform_4, window_bounds = array<i64: 1, 512>}]} {
    %c0 = arith.constant 0 : index
    %c0_0 = arith.constant 0 : index
    %0 = vector.load %arg1[%c0, %c0_0] : memref<32x512xf32, #tpu.memory_space<vmem>>, vector<32x512xf32>
    %c0_1 = arith.constant 0 : index
    %c0_2 = arith.constant 0 : index
    %1 = vector.load %arg2[%c0_1, %c0_2] : memref<32x512xf32, #tpu.memory_space<vmem>>, vector<32x512xf32>
    %c0_3 = arith.constant 0 : index
    %c0_4 = arith.constant 0 : index
    %2 = vector.load %arg3[%c0_3, %c0_4] : memref<1x512xf32, #tpu.memory_space<vmem>>, vector<1x512xf32>
    %c0_5 = arith.constant 0 : index
    %c0_6 = arith.constant 0 : index
    %3 = vector.load %arg4[%c0_5, %c0_6] : memref<1x512xf32, #tpu.memory_space<vmem>>, vector<1x512xf32>
    %4 = vector.extract_strided_slice %0 {offsets = [0, 0], sizes = [1, 512], strides = [1, 1]} : vector<32x512xf32> to vector<1x512xf32>
    %5 = arith.addf %4, %2 : vector<1x512xf32>
    %cst = arith.constant 7.000000e+00 : f32
    %6 = vector.broadcast %cst : f32 to vector<1x512xf32>
    %7 = arith.divf %5, %6 : vector<1x512xf32>
    %8 = vector.extract_strided_slice %0 {offsets = [1, 0], sizes = [1, 512], strides = [1, 1]} : vector<32x512xf32> to vector<1x512xf32>
    %9 = arith.addf %8, %3 : vector<1x512xf32>
    %cst_7 = arith.constant 7.000000e+00 : f32
    %10 = vector.broadcast %cst_7 : f32 to vector<1x512xf32>
    %11 = arith.divf %9, %10 : vector<1x512xf32>
    %12 = vector.extract_strided_slice %0 {offsets = [2, 0], sizes = [1, 512], strides = [1, 1]} : vector<32x512xf32> to vector<1x512xf32>
    %cst_8 = arith.constant 5.000000e-01 : f32
    %13 = vector.broadcast %cst_8 : f32 to vector<1x512xf32>
    %14 = arith.mulf %12, %13 : vector<1x512xf32>
    %15 = vector.extract_strided_slice %0 {offsets = [3, 0], sizes = [1, 512], strides = [1, 1]} : vector<32x512xf32> to vector<1x512xf32>
    %cst_9 = arith.constant 5.000000e-01 : f32
    %16 = vector.broadcast %cst_9 : f32 to vector<1x512xf32>
    %17 = arith.mulf %15, %16 : vector<1x512xf32>
    %18 = arith.subf %7, %14 : vector<1x512xf32>
    %19 = arith.subf %11, %17 : vector<1x512xf32>
    %20 = arith.addf %7, %14 : vector<1x512xf32>
    %21 = arith.addf %11, %17 : vector<1x512xf32>
    %22 = vector.extract_strided_slice %0 {offsets = [5, 0], sizes = [1, 512], strides = [1, 1]} : vector<32x512xf32> to vector<1x512xf32>
    %23 = arith.addf %22, %2 : vector<1x512xf32>
    %cst_10 = arith.constant 7.000000e+00 : f32
    %24 = vector.broadcast %cst_10 : f32 to vector<1x512xf32>
    %25 = arith.divf %23, %24 : vector<1x512xf32>
    %26 = vector.extract_strided_slice %0 {offsets = [6, 0], sizes = [1, 512], strides = [1, 1]} : vector<32x512xf32> to vector<1x512xf32>
    %27 = arith.addf %26, %3 : vector<1x512xf32>
    %cst_11 = arith.constant 7.000000e+00 : f32
    %28 = vector.broadcast %cst_11 : f32 to vector<1x512xf32>
    %29 = arith.divf %27, %28 : vector<1x512xf32>
    %30 = vector.extract_strided_slice %0 {offsets = [7, 0], sizes = [1, 512], strides = [1, 1]} : vector<32x512xf32> to vector<1x512xf32>
    %cst_12 = arith.constant 5.000000e-01 : f32
    %31 = vector.broadcast %cst_12 : f32 to vector<1x512xf32>
    %32 = arith.mulf %30, %31 : vector<1x512xf32>
    %33 = vector.extract_strided_slice %0 {offsets = [8, 0], sizes = [1, 512], strides = [1, 1]} : vector<32x512xf32> to vector<1x512xf32>
    %cst_13 = arith.constant 5.000000e-01 : f32
    %34 = vector.broadcast %cst_13 : f32 to vector<1x512xf32>
    %35 = arith.mulf %33, %34 : vector<1x512xf32>
    %36 = arith.subf %25, %32 : vector<1x512xf32>
    %37 = arith.subf %29, %35 : vector<1x512xf32>
    %38 = arith.addf %25, %32 : vector<1x512xf32>
    %39 = arith.addf %29, %35 : vector<1x512xf32>
    %40 = vector.extract_strided_slice %1 {offsets = [0, 0], sizes = [1, 512], strides = [1, 1]} : vector<32x512xf32> to vector<1x512xf32>
    %41 = arith.addf %40, %2 : vector<1x512xf32>
    %cst_14 = arith.constant 7.000000e+00 : f32
    %42 = vector.broadcast %cst_14 : f32 to vector<1x512xf32>
    %43 = arith.divf %41, %42 : vector<1x512xf32>
    %44 = vector.extract_strided_slice %1 {offsets = [1, 0], sizes = [1, 512], strides = [1, 1]} : vector<32x512xf32> to vector<1x512xf32>
    %45 = arith.addf %44, %3 : vector<1x512xf32>
    %cst_15 = arith.constant 7.000000e+00 : f32
    %46 = vector.broadcast %cst_15 : f32 to vector<1x512xf32>
    %47 = arith.divf %45, %46 : vector<1x512xf32>
    %48 = vector.extract_strided_slice %1 {offsets = [2, 0], sizes = [1, 512], strides = [1, 1]} : vector<32x512xf32> to vector<1x512xf32>
    %cst_16 = arith.constant 5.000000e-01 : f32
    %49 = vector.broadcast %cst_16 : f32 to vector<1x512xf32>
    %50 = arith.mulf %48, %49 : vector<1x512xf32>
    %51 = vector.extract_strided_slice %1 {offsets = [3, 0], sizes = [1, 512], strides = [1, 1]} : vector<32x512xf32> to vector<1x512xf32>
    %cst_17 = arith.constant 5.000000e-01 : f32
    %52 = vector.broadcast %cst_17 : f32 to vector<1x512xf32>
    %53 = arith.mulf %51, %52 : vector<1x512xf32>
    %54 = arith.subf %43, %50 : vector<1x512xf32>
    %55 = arith.subf %47, %53 : vector<1x512xf32>
    %56 = arith.addf %43, %50 : vector<1x512xf32>
    %57 = arith.addf %47, %53 : vector<1x512xf32>
    %58 = arith.cmpf olt, %20, %54 : vector<1x512xf32>
    %59 = arith.cmpf ogt, %18, %56 : vector<1x512xf32>
    %60 = arith.ori %58, %59 : vector<1x512xi1>
    %61 = arith.cmpf olt, %21, %55 : vector<1x512xf32>
    %62 = arith.ori %60, %61 : vector<1x512xi1>
    %63 = arith.cmpf ogt, %19, %57 : vector<1x512xf32>
    %64 = arith.ori %62, %63 : vector<1x512xi1>
    %65 = arith.maximumf %18, %54 : vector<1x512xf32>
    %66 = arith.maximumf %19, %55 : vector<1x512xf32>
    %67 = arith.minimumf %20, %56 : vector<1x512xf32>
    %68 = arith.minimumf %21, %57 : vector<1x512xf32>
    %69 = arith.subf %20, %18 : vector<1x512xf32>
    %70 = arith.subf %21, %19 : vector<1x512xf32>
    %71 = arith.mulf %69, %70 : vector<1x512xf32>
    %72 = arith.subf %56, %54 : vector<1x512xf32>
    %73 = arith.subf %57, %55 : vector<1x512xf32>
    %74 = arith.mulf %72, %73 : vector<1x512xf32>
    %75 = arith.subf %67, %65 : vector<1x512xf32>
    %76 = arith.subf %68, %66 : vector<1x512xf32>
    %77 = arith.mulf %75, %76 : vector<1x512xf32>
    %cst_18 = arith.constant 0.000000e+00 : f32
    %78 = vector.broadcast %cst_18 : f32 to vector<1x512xf32>
    %79 = arith.select %64, %78, %77 : vector<1x512xi1>, vector<1x512xf32>
    %80 = arith.addf %71, %74 : vector<1x512xf32>
    %81 = arith.subf %80, %79 : vector<1x512xf32>
    %cst_19 = arith.constant 0.000000e+00 : f32
    %82 = vector.broadcast %cst_19 : f32 to vector<1x512xf32>
    %83 = arith.cmpf ogt, %79, %82 : vector<1x512xf32>
    %84 = arith.divf %79, %81 : vector<1x512xf32>
    %cst_20 = arith.constant 0.000000e+00 : f32
    %85 = vector.broadcast %cst_20 : f32 to vector<1x512xf32>
    %86 = arith.select %83, %84, %85 : vector<1x512xi1>, vector<1x512xf32>
    %87 = arith.cmpf olt, %38, %54 : vector<1x512xf32>
    %88 = arith.cmpf ogt, %36, %56 : vector<1x512xf32>
    %89 = arith.ori %87, %88 : vector<1x512xi1>
    %90 = arith.cmpf olt, %39, %55 : vector<1x512xf32>
    %91 = arith.ori %89, %90 : vector<1x512xi1>
    %92 = arith.cmpf ogt, %37, %57 : vector<1x512xf32>
    %93 = arith.ori %91, %92 : vector<1x512xi1>
    %94 = arith.maximumf %36, %54 : vector<1x512xf32>
    %95 = arith.maximumf %37, %55 : vector<1x512xf32>
    %96 = arith.minimumf %38, %56 : vector<1x512xf32>
    %97 = arith.minimumf %39, %57 : vector<1x512xf32>
    %98 = arith.subf %38, %36 : vector<1x512xf32>
    %99 = arith.subf %39, %37 : vector<1x512xf32>
    %100 = arith.mulf %98, %99 : vector<1x512xf32>
    %101 = arith.subf %56, %54 : vector<1x512xf32>
    %102 = arith.subf %57, %55 : vector<1x512xf32>
    %103 = arith.mulf %101, %102 : vector<1x512xf32>
    %104 = arith.subf %96, %94 : vector<1x512xf32>
    %105 = arith.subf %97, %95 : vector<1x512xf32>
    %106 = arith.mulf %104, %105 : vector<1x512xf32>
    %cst_21 = arith.constant 0.000000e+00 : f32
    %107 = vector.broadcast %cst_21 : f32 to vector<1x512xf32>
    %108 = arith.select %93, %107, %106 : vector<1x512xi1>, vector<1x512xf32>
    %109 = arith.addf %100, %103 : vector<1x512xf32>
    %110 = arith.subf %109, %108 : vector<1x512xf32>
    %cst_22 = arith.constant 0.000000e+00 : f32
    %111 = vector.broadcast %cst_22 : f32 to vector<1x512xf32>
    %112 = arith.cmpf ogt, %108, %111 : vector<1x512xf32>
    %113 = arith.divf %108, %110 : vector<1x512xf32>
    %cst_23 = arith.constant 0.000000e+00 : f32
    %114 = vector.broadcast %cst_23 : f32 to vector<1x512xf32>
    %115 = arith.select %112, %113, %114 : vector<1x512xi1>, vector<1x512xf32>
    %116 = arith.cmpf oge, %86, %115 : vector<1x512xf32>
    %117 = vector.extract_strided_slice %0 {offsets = [0, 0], sizes = [4, 512], strides = [1, 1]} : vector<32x512xf32> to vector<4x512xf32>
    %118 = vector.extract_strided_slice %0 {offsets = [5, 0], sizes = [4, 512], strides = [1, 1]} : vector<32x512xf32> to vector<4x512xf32>
    %119 = vector.shape_cast %116 : vector<1x512xi1> to vector<1x512xi1>
    %120 = vector.broadcast %119 : vector<1x512xi1> to vector<4x512xi1>
    %121 = arith.select %120, %117, %118 : vector<4x512xi1>, vector<4x512xf32>
    %122 = vector.extract_strided_slice %1 {offsets = [0, 0], sizes = [4, 512], strides = [1, 1]} : vector<32x512xf32> to vector<4x512xf32>
    %123 = vector.extract_strided_slice %1 {offsets = [5, 0], sizes = [4, 512], strides = [1, 1]} : vector<32x512xf32> to vector<4x512xf32>
    %124 = vector.shape_cast %116 : vector<1x512xi1> to vector<1x512xi1>
    %125 = vector.broadcast %124 : vector<1x512xi1> to vector<4x512xi1>
    %126 = arith.select %125, %122, %123 : vector<4x512xi1>, vector<4x512xf32>
    %127 = vector.extract_strided_slice %121 {offsets = [0, 0], sizes = [2, 512], strides = [1, 1]} : vector<4x512xf32> to vector<2x512xf32>
    %128 = vector.extract_strided_slice %126 {offsets = [0, 0], sizes = [2, 512], strides = [1, 1]} : vector<4x512xf32> to vector<2x512xf32>
    %129 = arith.subf %127, %128 : vector<2x512xf32>
    %130 = arith.mulf %129, %129 : vector<2x512xf32>
    %cst_24 = arith.constant dense<0.000000e+00> : vector<512xf32>
    %131 = vector.multi_reduction <add>, %130, %cst_24 [0] : vector<2x512xf32> to vector<512xf32>
    %132 = vector.shape_cast %131 : vector<512xf32> to vector<1x512xf32>
    %133 = vector.extract_strided_slice %121 {offsets = [2, 0], sizes = [2, 512], strides = [1, 1]} : vector<4x512xf32> to vector<2x512xf32>
    %134 = math.sqrt %133 : vector<2x512xf32>
    %135 = vector.extract_strided_slice %126 {offsets = [2, 0], sizes = [2, 512], strides = [1, 1]} : vector<4x512xf32> to vector<2x512xf32>
    %136 = math.sqrt %135 : vector<2x512xf32>
    %137 = arith.subf %134, %136 : vector<2x512xf32>
    %138 = arith.mulf %137, %137 : vector<2x512xf32>
    %cst_25 = arith.constant dense<0.000000e+00> : vector<512xf32>
    %139 = vector.multi_reduction <add>, %138, %cst_25 [0] : vector<2x512xf32> to vector<512xf32>
    %140 = vector.shape_cast %139 : vector<512xf32> to vector<1x512xf32>
    %141 = arith.addf %132, %140 : vector<1x512xf32>
    %cst_26 = arith.constant 5.000000e+00 : f32
    %142 = vector.broadcast %cst_26 : f32 to vector<1x512xf32>
    %143 = arith.mulf %142, %141 : vector<1x512xf32>
    %144 = vector.extract_strided_slice %0 {offsets = [4, 0], sizes = [1, 512], strides = [1, 1]} : vector<32x512xf32> to vector<1x512xf32>
    %145 = vector.extract_strided_slice %0 {offsets = [9, 0], sizes = [1, 512], strides = [1, 1]} : vector<32x512xf32> to vector<1x512xf32>
    %146 = arith.subf %144, %86 : vector<1x512xf32>
    %147 = arith.mulf %146, %146 : vector<1x512xf32>
    %148 = arith.subf %145, %115 : vector<1x512xf32>
    %149 = arith.mulf %148, %148 : vector<1x512xf32>
    %150 = arith.select %116, %147, %149 : vector<1x512xi1>, vector<1x512xf32>
    %151 = arith.select %116, %149, %147 : vector<1x512xi1>, vector<1x512xf32>
    %cst_27 = arith.constant 5.000000e-01 : f32
    %152 = vector.broadcast %cst_27 : f32 to vector<1x512xf32>
    %153 = arith.mulf %152, %151 : vector<1x512xf32>
    %154 = vector.extract_strided_slice %0 {offsets = [10, 0], sizes = [20, 512], strides = [1, 1]} : vector<32x512xf32> to vector<20x512xf32>
    %155 = vector.extract_strided_slice %1 {offsets = [10, 0], sizes = [20, 512], strides = [1, 1]} : vector<32x512xf32> to vector<20x512xf32>
    %156 = arith.subf %154, %155 : vector<20x512xf32>
    %157 = arith.mulf %156, %156 : vector<20x512xf32>
    %cst_28 = arith.constant dense<0.000000e+00> : vector<512xf32>
    %158 = vector.multi_reduction <add>, %157, %cst_28 [0] : vector<20x512xf32> to vector<512xf32>
    %159 = vector.shape_cast %158 : vector<512xf32> to vector<1x512xf32>
    %160 = arith.addf %143, %150 : vector<1x512xf32>
    %161 = arith.addf %160, %153 : vector<1x512xf32>
    %162 = arith.addf %161, %159 : vector<1x512xf32>
    %163 = arith.mulf %144, %144 : vector<1x512xf32>
    %164 = arith.mulf %145, %145 : vector<1x512xf32>
    %165 = arith.addf %163, %164 : vector<1x512xf32>
    %cst_29 = arith.constant 5.000000e-01 : f32
    %166 = vector.broadcast %cst_29 : f32 to vector<1x512xf32>
    %167 = arith.mulf %166, %165 : vector<1x512xf32>
    %168 = vector.extract_strided_slice %1 {offsets = [4, 0], sizes = [1, 512], strides = [1, 1]} : vector<32x512xf32> to vector<1x512xf32>
    %cst_30 = arith.constant 1.000000e+00 : f32
    %169 = vector.broadcast %cst_30 : f32 to vector<1x512xf32>
    %170 = arith.cmpf oeq, %168, %169 : vector<1x512xf32>
    %171 = arith.select %170, %162, %167 : vector<1x512xi1>, vector<1x512xf32>
    %c0_31 = arith.constant 0 : index
    %c0_32 = arith.constant 0 : index
    %172 = vector.load %arg5[%c0_31, %c0_32] : memref<1x512xf32, #tpu.memory_space<vmem>>, vector<1x512xf32>
    tpu.vector_store %arg5[%c0_31, %c0_32], %171 {strides = array<i32>} : memref<1x512xf32, #tpu.memory_space<vmem>>, vector<1x512xf32>,
    return
  }
  func.func @transform_0(%arg0: i32) -> (i32, i32) {
    %c0_i32 = arith.constant 0 : i32
    %c0_i32_0 = arith.constant 0 : i32
    return %c0_i32, %arg0 : i32, i32
  }
  func.func @transform_1(%arg0: i32) -> (i32, i32) {
    %c0_i32 = arith.constant 0 : i32
    %c0_i32_0 = arith.constant 0 : i32
    return %c0_i32, %arg0 : i32, i32
  }
  func.func @transform_2(%arg0: i32) -> (i32, i32) {
    %c0_i32 = arith.constant 0 : i32
    %c0_i32_0 = arith.constant 0 : i32
    return %c0_i32, %arg0 : i32, i32
  }
  func.func @transform_3(%arg0: i32) -> (i32, i32) {
    %c0_i32 = arith.constant 0 : i32
    %c0_i32_0 = arith.constant 0 : i32
    return %c0_i32, %arg0 : i32, i32
  }
  func.func @transform_4(%arg0: i32) -> (i32, i32) {
    %c0_i32 = arith.constant 0 : i32
    %c0_i32_0 = arith.constant 0 : i32
    return %c0_i32, %arg0 : i32, i32
  }
}

</mosaic_0001>

<bundles_post_ra>
// kernel: tile.18
= control target key start
LH: loop header
LB: loop body
LE: loop exit
PB: predicated region body
PF: predicated region fallthrough
CT: control target
= control target key end

     0   :  { %s59_s10 = smov 42   ;;  %s60_s11 = smov 28   ;;  %vm3_vm0 = vcmask 56320   ;;  %vm9_vm1 = vcmask 400720   ;;  %vm15_vm2 = vcmask 343320   ;;  %vm21_vm3 = vcmask 285920   ;;  %s99_s0 = inlined_call_operand.vmem [shape: f32[7,7], index: 0, kind: input, shape index: {}]   ;;  %s100_s1 = inlined_call_operand.vmem [shape: f32[49], index: 1, kind: output, shape index: {}]  }
   0x1   :  { %v47_v0 = vld [vmem:[%s99_s0 + $0x6] sm:$0x1]   ;;  %v49_v1 = vld [vmem:[%s99_s0 + $0x4] sm:$0x1]   ;;  %v51_v2 = vld [vmem:[%s99_s0 + $0x2] sm:$0x1]  }
   0x2   :  { %7 = vrot.lane.b32.xlu0 %v47_v0, %s59_s10  ;;  %19 = vrot.lane.b32.xlu1 %v49_v1, %s60_s11  ;;  %s61_s14 = smov 14   ;;  %v48_v3 = vld [vmem:[%s99_s0 + $0x5] sm:$0x1]   ;;  %v50_v4 = vld [vmem:[%s99_s0 + $0x3] sm:$0x1]   ;;  %s62_s21 = smov 35  }
   0x3   :  { %31 = vrot.lane.b32.xlu2 %v51_v2, %s61_s14  ;;  %v52_v5 = vld [vmem:[%s99_s0 + $0x1] sm:$0x1]   ;;  %s63_s22 = smov 21   ;;  %s64_s23 = smov 7   ;;  %v2_v6 = vld [vmem:[%s99_s0] sm:$0x1]  }
   0x4   :  { %4 = vst.msk [vmem:[#allocation0] sm:$0x1] %vm3_vm0, %v2_v6   ;;  %vm27_vm4 = vcmask 228520   ;;  %vm33_vm5 = vcmask 171120   ;;  %vm39_vm6 = vcmask 113720  }
   0xa   :  { %13 = vrot.lane.b32.xlu0 %v48_v3, %s62_s21  ;;  %25 = vrot.lane.b32.xlu1 %v50_v4, %s63_s22 }
   0xb   :  { %37 = vrot.lane.b32.xlu2 %v52_v5, %s64_s23 }
  0x5d   :  { %v32_v7 = vpop.permute.xlu2 %31  }
  0x65   :  { %v38_v8 = vpop.permute.xlu2 %37  }
  0x74   :  { %v8_v9 = vpop.permute.xlu0 %7   ;;  %v20_v10 = vpop.permute.xlu1 %19  }
  0x75   :  { %10 = vst.msk [vmem:[#allocation0] sm:$0x1] %vm9_vm1, %v8_v9  }
  0x7c   :  { %v14_v11 = vpop.permute.xlu0 %13   ;;  %v26_v12 = vpop.permute.xlu1 %25  }
  0x7d   :  { %16 = vst.msk [vmem:[#allocation0] sm:$0x1] %vm15_vm2, %v14_v11  }
  0x7e   :  { %22 = vst.msk [vmem:[#allocation0] sm:$0x1] %vm21_vm3, %v20_v10  }
  0x7f   :  { %28 = vst.msk [vmem:[#allocation0] sm:$0x1] %vm27_vm4, %v26_v12  }
  0x80   :  { %34 = vst.msk [vmem:[#allocation0] sm:$0x1] %vm33_vm5, %v32_v7  }
  0x81   :  { %40 = vst.msk [vmem:[#allocation0] sm:$0x1] %vm39_vm6, %v38_v8  }
  0x88   :  { %v43_v13 = vld [vmem:[#allocation0] sm:$0x1] }
  0x89   :  { %46 = vst [vmem:[%s100_s1] sm:$0x1] %v43_v13 }

// kernel: tile.19
= control target key start
LH: loop header
LB: loop body
LE: loop exit
PB: predicated region body
PF: predicated region fallthrough
CT: control target
= control target key end

     0   :  { %s22_s0 = inlined_call_operand.vmem [shape: f32[49], index: 0, kind: input, shape index: {}]   ;;  %s23_s1 = inlined_call_operand.vmem [shape: f32[2,49], index: 1, kind: output, shape index: {}]  }
   0x1   :  { %v4_v0 = vld [vmem:[%s22_s0] ss:$0 sm:$0xff] }
   0x2   :  { %5 = vst [vmem:[%s23_s1] sm:$0x3] %v4_v0 }

// kernel: tile.20
= control target key start
LH: loop header
LB: loop body
LE: loop exit
PB: predicated region body
PF: predicated region fallthrough
CT: control target
= control target key end

     0   :  { %vm7_vm0 = vcmask 400384   ;;  %vm13_vm1 = vcmask 802184   ;;  %s39_s0 = inlined_call_operand.vmem [shape: f32[2,49], index: 0, kind: input, shape index: {}]   ;;  %s40_s1 = inlined_call_operand.vmem [shape: f32[98], index: 1, kind: output, shape index: {}]  }
   0x1   :  { %v4_v0 = vld [vmem:[%s39_s0] sm:$0x3]  ;;  %s22_s0 = smov 49  }
   0x2   :  { %5 = vst [vmem:[#allocation1] sm:$0x3] %v4_v0 }
   0x9   :  { %v10_v1 = vld [vmem:[#allocation1 + $0x1] sm:$0x1]   ;;  %v6_v2 = vld [vmem:[#allocation1] sm:$0x1]  }
   0xa   :  { %11 = vrot.lane.b32.xlu0 %v10_v1, %s22_s0  ;;  %8 = vst.msk [vmem:[#allocation0] sm:$0x1] %vm7_vm0, %v6_v2  }
  0x7c   :  { %v12_v3 = vpop.permute.xlu0 %11  }
  0x7d   :  { %14 = vst.msk [vmem:[#allocation0] sm:$0x1] %vm13_vm1, %v12_v3  }
  0x84   :  { %v17_v4 = vld [vmem:[#allocation0] sm:$0x1] }
  0x85   :  { %20 = vst [vmem:[%s40_s1] sm:$0x1] %v17_v4 }

// kernel: loss_yolov1_forward.1
= control target key start
LH: loop header
LB: loop body
LE: loop exit
PB: predicated region body
PF: predicated region fallthrough
CT: control target
= control target key end

     0   :  { %v1248_v0 = vmov 7.0   ;;  %s2779_s0 = inlined_call_operand.vmem [shape: f32[32,512], index: 0, kind: input, shape index: {}]   ;;  %s2780_s1 = inlined_call_operand.vmem [shape: f32[32,512], index: 1, kind: input, shape index: {}]   ;;  %s2781_s2 = inlined_call_operand.vmem [shape: f32[1,512], index: 2, kind: input, shape index: {}]   ;;  %s2782_s3 = inlined_call_operand.vmem [shape: f32[1,512], index: 3, kind: input, shape index: {}]   ;;  %s2783_s4 = inlined_call_operand.vmem [shape: f32[1,512], index: 4, kind: output, shape index: {}]  }
   0x1   :  { %1202 = vrcp.f32 %v1248_v0  ;;  %v1278_v1 = vld [vmem:[%s2779_s0] sm:$0xff]  ;;  %v1283_v3 = vld [vmem:[%s2779_s0 + $0x8] sm:$0xff]  ;;  %v1288_v4 = vld [vmem:[%s2779_s0 + $0x10] sm:$0xff] }
   0x2   :  { %2845 = vst [vmem:[#allocation2_spill] sm:$0xff] %v1278_v1  ;;  %v1293_v5 = vld [vmem:[%s2779_s0 + $0x20] sm:$0xff]  ;;  %v1298_v6 = vld [vmem:[%s2779_s0 + $0x18] sm:$0xff]  ;;  %v92_v8 = vmul.f32 0.5, %v1278_v1  ;;  %v93_v9 = vmul.f32 0.5, %v1283_v3  ;;  %v94_v10 = vmul.f32 0.5, %v1288_v4 }
   0x3   :  { %2846 = vst [vmem:[#allocation3_spill] sm:$0xff] %v1283_v3  ;;  %v1306_v11 = vld [vmem:[%s2779_s0 + $0x28] sm:$0xff]  ;;  %v95_v12 = vmul.f32 0.5, %v1298_v6  ;;  %v1312_v13 = vld [vmem:[%s2779_s0 + $0x30] sm:$0xff]  ;;  %v1317_v14 = vld [vmem:[%s2779_s0 + $0x38] sm:$0xff]  ;;  %v1320_v16 = vmul.f32 0.5, %v1293_v5 }
   0x4   :  { %2847 = vst [vmem:[#allocation4_spill] sm:$0xff] %v1288_v4  ;;  %v1325_v17 = vld [vmem:[%s2780_s1] sm:$0xff]  ;;  %v1330_v19 = vrot.slane %v92_v8, 2  ;;  %v1332_v20 = vrot.slane %v93_v9, 2  ;;  %v1334_v21 = vrot.slane %v94_v10, 2  ;;  %v1337_v22 = vmul.f32 0.5, %v1306_v11 }
   0x5   :  { %2848 = vst [vmem:[#allocation5_spill] sm:$0xff] %v1293_v5  ;;  %v49_v18 = vld [vmem:[%s2781_s2] sm:$0xf]  ;;  %v34_v23 = vld [vmem:[%s2780_s1 + $0x8] sm:$0xff]  ;;  %v35_v24 = vld [vmem:[%s2780_s1 + $0x10] sm:$0xff]  ;;  %v1345_v26 = vrot.slane %v95_v12, 2 }
   0x6   :  { %2849 = vst [vmem:[#allocation6_spill] sm:$0xff] %v1298_v6  ;;  %v1348_v27 = vmul.f32 0.5, %v1312_v13  ;;  %v1351_v28 = vmul.f32 0.5, %v1317_v14  ;;  %v50_v29 = vld [vmem:[%s2782_s3] sm:$0xf]  ;;  %v52_v30 = vperm.slane %v49_v18, 0 }
   0x7   :  { %v1203_v2 = vpop.eup %1202  ;;  %2850 = vst [vmem:[#allocation7_spill] sm:$0xff] %v1306_v11  ;;  %v53_v31 = vperm.slane %v49_v18, 1  ;;  %v164_v33 = vmul.f32 0.5, %v1325_v17  ;;  %v36_v34 = vld [vmem:[%s2780_s1 + $0x18] sm:$0xff]  ;;  %v54_v35 = vperm.slane %v49_v18, 2  ;;  %v55_v36 = vperm.slane %v49_v18, 3 }
   0x8   :  { %v65_v7 = vmul.f32 7.0, %v1203_v2  ;;  %2851 = vst [vmem:[#allocation8_spill] sm:$0xff] %v1312_v13  ;;  %vm69_vm0 = vweird.f32 %v1203_v2  ;;  %v60_v38 = vadd.f32 %v52_v30, %v1278_v1  ;;  %v165_v40 = vmul.f32 0.5, %v34_v23 }
   0x9   :  { %2852 = vst [vmem:[#allocation9_spill] sm:$0xff] %v1317_v14  ;;  %v61_v39 = vadd.f32 %v53_v31, %v1283_v3  ;;  %v166_v41 = vmul.f32 0.5, %v35_v24  ;;  %v62_v42 = vadd.f32 %v54_v35, %v1288_v4  ;;  %v63_v43 = vadd.f32 %v55_v36, %v1298_v6 }
   0xa   :  { %v66_v15 = vsub.f32 1.0, %v65_v7  ;;  %2853 = vst [vmem:[#allocation10_spill] sm:$0xff] %v1320_v16  ;;  %v76_v44 = vperm.slane %v50_v29, 0  ;;  %v77_v45 = vperm.slane %v50_v29, 1  ;;  %v78_v46 = vperm.slane %v50_v29, 2 }
   0xb   :  { %2854 = vst [vmem:[#allocation11_spill] sm:$0xff] %v1325_v17  ;;  %v79_v47 = vperm.slane %v50_v29, 3  ;;  %v167_v48 = vmul.f32 0.5, %v36_v34  ;;  %v172_v52 = vrot.slane %v164_v33, 2  ;;  %v173_v59 = vrot.slane %v165_v40, 2 }
   0xc   :  { %v67_v25 = vmul.f32 %v1203_v2, %v66_v15  ;;  %v84_v50 = vadd.f32 %v76_v44, %v1278_v1  ;;  %v85_v51 = vadd.f32 %v77_v45, %v1283_v3  ;;  %v86_v55 = vadd.f32 %v78_v46, %v1288_v4 }
   0xd   :  { %v87_v56 = vadd.f32 %v79_v47, %v1298_v6  ;;  %v174_v60 = vrot.slane %v166_v41, 2  ;;  %v148_v61 = vadd.f32 %v52_v30, %v1325_v17  ;;  %v149_v62 = vadd.f32 %v53_v31, %v34_v23 }
   0xe   :  { %v68_v37 = vadd.f32 %v1203_v2, %v67_v25  ;;  %v150_v63 = vadd.f32 %v54_v35, %v35_v24  ;;  %v175_v0 = vrot.slane %v167_v48, 2  ;;  %v151_v8 = vadd.f32 %v55_v36, %v36_v34 }
   0xf   :  { %v156_v9 = vadd.f32 %v76_v44, %v1325_v17  ;;  %v158_v40 = vadd.f32 %v78_v46, %v35_v24  ;;  %v159_v41 = vadd.f32 %v79_v47, %v36_v34 }
  0x10   :  { %v70_v49 = vsel %vm69_vm0, %v1203_v2, %v68_v37 }
  0x11   :  { %v71_v53 = vmul.f32 %v70_v49, %v60_v38  ;;  %v72_v54 = vmul.f32 %v70_v49, %v61_v39  ;;  %v73_v57 = vmul.f32 %v70_v49, %v62_v42  ;;  %v74_v58 = vmul.f32 %v70_v49, %v63_v43 }
  0x12   :  { %v1370_v2 = vmul.f32 %v84_v50, %v70_v49  ;;  %v1372_v7 = vmul.f32 %v85_v51, %v70_v49  ;;  %v1375_v10 = vmul.f32 %v86_v55, %v70_v49  ;;  %v1377_v12 = vmul.f32 %v87_v56, %v70_v49 }
  0x13   :  { %v1380_v15 = vsub.f32 %v71_v53, %v1330_v19  ;;  %v1383_v18 = vsub.f32 %v72_v54, %v1332_v20  ;;  %v1386_v25 = vsub.f32 %v73_v57, %v1334_v21  ;;  %v1389_v29 = vsub.f32 %v74_v58, %v1345_v26 }
  0x14   :  { %2855 = vst [vmem:[#allocation12_spill] sm:$0xff] %v1370_v2  ;;  %v1393_v30 = vsub.f32 %v1370_v2, %v1330_v19  ;;  %v1397_v31 = vsub.f32 %v1372_v7, %v1332_v20  ;;  %v1401_v33 = vsub.f32 %v1375_v10, %v1334_v21  ;;  %v1405_v35 = vsub.f32 %v1377_v12, %v1345_v26 }
  0x15   :  { %2856 = vst [vmem:[#allocation13_spill] sm:$0xff] %v1372_v7  ;;  %v152_v36 = vmul.f32 %v148_v61, %v70_v49  ;;  %v153_v37 = vmul.f32 %v149_v62, %v70_v49  ;;  %v154_v38 = vmul.f32 %v150_v63, %v70_v49  ;;  %v157_v39 = vadd.f32 %v77_v45, %v34_v23 }
  0x16   :  { %2857 = vst [vmem:[#allocation14_spill] sm:$0xff] %v1375_v10  ;;  %v1408_v42 = vadd.f32 %v1330_v19, %v71_v53  ;;  %v1411_v43 = vadd.f32 %v1332_v20, %v72_v54  ;;  %v155_v44 = vmul.f32 %v151_v8, %v70_v49  ;;  %v160_v48 = vmul.f32 %v156_v9, %v70_v49 }
  0x17   :  { %2858 = vst [vmem:[#allocation15_spill] sm:$0xff] %v1377_v12  ;;  %v1414_v50 = vadd.f32 %v1334_v21, %v73_v57  ;;  %v161_v51 = vmul.f32 %v157_v39, %v70_v49  ;;  %v162_v55 = vmul.f32 %v158_v40, %v70_v49  ;;  %v163_v56 = vmul.f32 %v159_v41, %v70_v49 }
  0x18   :  { %2859 = vst [vmem:[#allocation16_spill] sm:$0xff] %v1380_v15  ;;  %v1417_v61 = vadd.f32 %v1345_v26, %v74_v58  ;;  %v1421_v23 = vadd.f32 %v1330_v19, %v1370_v2  ;;  %v1425_v24 = vadd.f32 %v1332_v20, %v1372_v7  ;;  %v1429_v34 = vadd.f32 %v1334_v21, %v1375_v10 }
  0x19   :  { %2860 = vst [vmem:[#allocation17_spill] sm:$0xff] %v1383_v18  ;;  %v1433_v45 = vadd.f32 %v1345_v26, %v1377_v12  ;;  %v1435_v46 = vsub.f32 %v152_v36, %v172_v52  ;;  %v1437_v47 = vsub.f32 %v153_v37, %v173_v59  ;;  %v1439_v49 = vsub.f32 %v154_v38, %v174_v60 }
  0x1a   :  { %2861 = vst [vmem:[#allocation18_spill] sm:$0xff] %v1386_v25  ;;  %v1441_v19 = vsub.f32 %v155_v44, %v175_v0  ;;  %v1443_v53 = vsub.f32 %v160_v48, %v172_v52  ;;  %v1445_v20 = vadd.f32 %v172_v52, %v152_v36  ;;  %v1447_v54 = vadd.f32 %v173_v59, %v153_v37 }
  0x1b   :  { %2862 = vst [vmem:[#allocation19_spill] sm:$0xff] %v1389_v29  ;;  %v1449_v21 = vsub.f32 %v161_v51, %v173_v59  ;;  %v1451_v57 = vsub.f32 %v162_v55, %v174_v60  ;;  %v1453_v26 = vsub.f32 %v163_v56, %v175_v0  ;;  %v1455_v58 = vadd.f32 %v174_v60, %v154_v38 }
  0x1c   :  { %2863 = vst [vmem:[#allocation20_spill] sm:$0xff] %v1408_v42  ;;  %v1457_v62 = vadd.f32 %v175_v0, %v155_v44  ;;  %v1459_v63 = vadd.f32 %v172_v52, %v160_v48  ;;  %v1461_v8 = vadd.f32 %v173_v59, %v161_v51  ;;  %vm208_vm1 = vcmp.lt.f32.partialorder %v1421_v23, %v1443_v53 }
  0x1d   :  { %2864 = vst [vmem:[#allocation21_spill] sm:$0xff] %v1411_v43  ;;  %vm209_vm2 = vcmp.lt.f32.partialorder %v1425_v24, %v1449_v21  ;;  %vm210_vm3 = vcmp.lt.f32.partialorder %v1429_v34, %v1451_v57  ;;  %vm211_vm4 = vcmp.lt.f32.partialorder %v1433_v45, %v1453_v26  ;;  %v2784_v9 = vmov 0  }
  0x1e   :  { %2865 = vst [vmem:[#allocation22_spill] sm:$0xff] %v1414_v50  ;;  %v212_v36 = vsel %vm208_vm1, 1, %v2784_v9  ;;  %v1472_v37 = vadd.f32 %v174_v60, %v162_v55  ;;  %v1474_v52 = vadd.f32 %v175_v0, %v163_v56  ;;  %v213_v59 = vsel %vm209_vm2, 1, %v2784_v9 }
  0x1f   :  { %2866 = vst [vmem:[#allocation23_spill] sm:$0xff] %v1417_v61  ;;  %v214_v38 = vsel %vm210_vm3, 1, %v2784_v9  ;;  %vm196_vm5 = vcmp.lt.f32.partialorder %v1408_v42, %v1435_v46  ;;  %v215_v39 = vsel %vm211_vm4, 1, %v2784_v9  ;;  %v216_v40 = vrot.slane %v212_v36, 1 }
  0x20   :  { %2867 = vst [vmem:[#allocation24_spill] sm:$0xff] %v1451_v57  ;;  %vm228_vm6 = vcmp.gt.f32.partialorder %v1393_v30, %v1459_v63  ;;  %v217_v41 = vrot.slane %v213_v59, 1  ;;  %vm229_vm7 = vcmp.gt.f32.partialorder %v1397_v31, %v1461_v8  ;;  %vm230_vm8 = vcmp.gt.f32.partialorder %v1401_v33, %v1472_v37 }
  0x21   :  { %2868 = vst [vmem:[#allocation25_spill] sm:$0xff] %v1453_v26  ;;  %vm231_vm9 = vcmp.gt.f32.partialorder %v1405_v35, %v1474_v52  ;;  %vm197_vm10 = vcmp.lt.f32.partialorder %v1411_v43, %v1437_v47  ;;  %vm198_vm11 = vcmp.lt.f32.partialorder %v1414_v50, %v1439_v49  ;;  %v218_v60 = vrot.slane %v214_v38, 1 }
  0x22   :  { %2869 = vst [vmem:[#allocation26_spill] sm:$0xff] %v1457_v62  ;;  %v232_v0 = vsel %vm228_vm6, 1, %v2784_v9  ;;  %v219_v44 = vrot.slane %v215_v39, 1  ;;  %v233_v48 = vsel %vm229_vm7, 1, %v2784_v9  ;;  %v234_v51 = vsel %vm230_vm8, 1, %v2784_v9  ;;  %v2912_v39 = vld [vmem:[#allocation10_spill] sm:$0xff] }
  0x23   :  { %2870 = vst [vmem:[#allocation27_spill] sm:$0xff] %v1459_v63  ;;  %v235_v55 = vsel %vm231_vm9, 1, %v2784_v9  ;;  %vm200_vm13 = vcmp.gt.f32.partialorder %v1380_v15, %v1445_v20  ;;  %vm201_vm14 = vcmp.gt.f32.partialorder %v1383_v18, %v1447_v54  ;;  %vm202_vm15 = vcmp.gt.f32.partialorder %v1386_v25, %v1455_v58 }
  0x24   :  { %2871 = vst [vmem:[#allocation28_spill] sm:$0xff] %v1461_v8  ;;  %v236_v56 = vrot.slane %v232_v0, 1  ;;  %vm203_vm0 = vcmp.gt.f32.partialorder %v1389_v29, %v1457_v62  ;;  %vm1507_vm1 = vcmp.ne.s32.totalorder %v216_v40, 0  ;;  %vm1511_vm2 = vcmp.ne.s32.totalorder %v217_v41, 0  ;;  %vm1575_vm9 = vmor %vm196_vm5, %vm200_vm13 }
  0x25   :  { %2872 = vst [vmem:[#allocation29_spill] sm:$0xff] %v1472_v37  ;;  %v237_v38 = vrot.slane %v233_v48, 1  ;;  %vm1515_vm3 = vcmp.ne.s32.totalorder %v218_v60, 0  ;;  %v238_v9 = vrot.slane %v234_v51, 1  ;;  %v239_v32 = vrot.slane %v235_v55, 1  ;;  %vm1599_vm5 = vmor %vm197_vm10, %vm201_vm14 }
  0x26   :  { %2873 = vst [vmem:[#allocation30_spill] sm:$0xff] %v1474_v52  ;;  %v248_v0 = vmax.f32 %v1380_v15, %v1435_v46  ;;  %vm1521_vm4 = vcmp.ne.s32.totalorder %v219_v44, 0  ;;  %v249_v40 = vmax.f32 %v1383_v18, %v1437_v47  ;;  %v250_v41 = vmax.f32 %v1386_v25, %v1439_v49  ;;  %vm1621_vm10 = vmor %vm198_vm11, %vm202_vm15 }
  0x27   :  { %v251_v60 = vmax.f32 %v1389_v29, %v1441_v19  ;;  %v252_v48 = vmax.f32 %v1393_v30, %v1443_v53  ;;  %vm1533_vm6 = vcmp.ne.s32.totalorder %v236_v56, 0  ;;  %v253_v44 = vmax.f32 %v1397_v31, %v1449_v21  ;;  %vm224_vm11 = vmor %vm1575_vm9, %vm1507_vm1 }
  0x28   :  { %v254_v55 = vmax.f32 %v1401_v33, %v1451_v57  ;;  %v255_v14 = vmax.f32 %v1405_v35, %v1453_v26  ;;  %v256_v6 = vmin.f32 %v1408_v42, %v1445_v20  ;;  %vm1545_vm7 = vcmp.ne.s32.totalorder %v237_v38, 0  ;;  %vm225_vm15 = vmor %vm1599_vm5, %vm1511_vm2 }
  0x29   :  { %v257_v56 = vmin.f32 %v1411_v43, %v1447_v54  ;;  %v258_v4 = vmin.f32 %v1414_v50, %v1455_v58  ;;  %v259_v11 = vmin.f32 %v1417_v61, %v1457_v62  ;;  %v260_v3 = vmin.f32 %v1421_v23, %v1459_v63  ;;  %vm2906_vm1 = vmor %vm1621_vm10, %vm1515_vm3 }
  0x2a   :  { %vm1557_vm8 = vcmp.ne.s32.totalorder %v238_v9, 0  ;;  %v261_v38 = vmin.f32 %v1425_v24, %v1461_v8  ;;  %v262_v1 = vmin.f32 %v1429_v34, %v1472_v37  ;;  %v263_v12 = vmin.f32 %v1433_v45, %v1474_v52 }
  0x2b   :  { %v268_v10 = vsub.f32 %v1421_v23, %v1393_v30  ;;  %vm1579_vm12 = vcmp.ne.s32.totalorder %v239_v32, 0  ;;  %v1585_v2 = vsub.f32 %v1408_v42, %v1380_v15  ;;  %v269_v30 = vsub.f32 %v1425_v24, %v1397_v31 }
  0x2c   :  { %v270_v23 = vsub.f32 %v1429_v34, %v1401_v33  ;;  %v271_v16 = vsub.f32 %v1433_v45, %v1405_v35  ;;  %v1605_v15 = vsub.f32 %v1411_v43, %v1383_v18  ;;  %v1609_v31 = vsub.f32 %v1414_v50, %v1386_v25 }
  0x2d   :  { %v1613_v33 = vsub.f32 %v1417_v61, %v1389_v29  ;;  %v276_v35 = vrot.slane %v268_v10, 1  ;;  %v277_v34 = vrot.slane %v269_v30, 1  ;;  %v292_v43 = vsub.f32 %v1459_v63, %v1443_v53 }
  0x2e   :  { %v278_v45 = vrot.slane %v270_v23, 1  ;;  %v279_v18 = vrot.slane %v271_v16, 1  ;;  %vm2896_vm13 = vcmp.lt.f32.partialorder %v1417_v61, %v1441_v19  ;;  %v288_v25 = vsub.f32 %v1445_v20, %v1435_v46 }
  0x2f   :  { %vm1633_vm14 = vmor %vm2896_vm13, %vm203_vm0  ;;  %v293_v30 = vsub.f32 %v1461_v8, %v1449_v21  ;;  %v294_v16 = vsub.f32 %v1472_v37, %v1451_v57  ;;  %v295_v23 = vsub.f32 %v1474_v52, %v1453_v26  ;;  %v289_v63 = vsub.f32 %v1447_v54, %v1437_v47 }
  0x30   :  { %v290_v29 = vsub.f32 %v1455_v58, %v1439_v49  ;;  %v291_v8 = vsub.f32 %v1457_v62, %v1441_v19  ;;  %v300_v61 = vrot.slane %v292_v43, 1  ;;  %v284_v52 = vmul.f32 %v276_v35, %v1585_v2  ;;  %vm1680_vm0 = vmor %vm224_vm11, %vm1533_vm6 }
  0x31   :  { %v301_v37 = vrot.slane %v293_v30, 1  ;;  %v302_v50 = vrot.slane %v294_v16, 1  ;;  %v303_v42 = vrot.slane %v295_v23, 1  ;;  %v285_v26 = vmul.f32 %v277_v34, %v1605_v15  ;;  %vm1691_vm13 = vmor %vm225_vm15, %vm1545_vm7 }
  0x32   :  { %v286_v62 = vmul.f32 %v278_v45, %v1609_v31  ;;  %v287_v43 = vmul.f32 %v279_v18, %v1613_v33  ;;  %v312_v57 = vsub.f32 %v256_v6, %v248_v0  ;;  %v1671_v35 = vmul.f32 %v300_v61, %v288_v25  ;;  %vm1708_vm6 = vmor %vm2906_vm1, %vm1557_vm8 }
  0x33   :  { %v313_v30 = vsub.f32 %v257_v56, %v249_v40  ;;  %v314_v16 = vsub.f32 %v258_v4, %v250_v41  ;;  %v316_v23 = vsub.f32 %v260_v3, %v252_v48  ;;  %v315_v6 = vsub.f32 %v259_v11, %v251_v60  ;;  %vm2909_vm2 = vmor %vm1633_vm14, %vm1521_vm4  ;;  %v2914_v41 = vld [vmem:[#allocation12_spill] sm:$0xff]  ;;  %v2915_v48 = vld [vmem:[#allocation13_spill] sm:$0xff] }
  0x34   :  { %v317_v0 = vsub.f32 %v261_v38, %v253_v44  ;;  %v318_v34 = vsub.f32 %v262_v1, %v254_v55  ;;  %v319_v45 = vsub.f32 %v263_v12, %v255_v14  ;;  %v1695_v4 = vmul.f32 %v301_v37, %v289_v63  ;;  %vm247_vm7 = vmor %vm2909_vm2, %vm1579_vm12  ;;  %v2916_v55 = vld [vmem:[#allocation14_spill] sm:$0xff]  ;;  %v2917_v38 = vld [vmem:[#allocation15_spill] sm:$0xff] }
  0x35   :  { %v1697_v25 = vmul.f32 %v302_v50, %v290_v29  ;;  %v1699_v61 = vmul.f32 %v303_v42, %v291_v8  ;;  %v324_v11 = vrot.slane %v316_v23, 1  ;;  %v340_v29 = vadd.f32 %v1671_v35, %v284_v52 }
  0x36   :  { %2903 = vst [vmem:[#allocation31_spill] sm:$0xff] %v1695_v4  ;;  %v325_v13 = vrot.slane %v317_v0, 1  ;;  %v326_v14 = vrot.slane %v318_v34, 1  ;;  %v327_v12 = vrot.slane %v319_v45, 1  ;;  %v133_v42 = vrot.slane %v1337_v22, 2 }
  0x37   :  { %2904 = vst [vmem:[#allocation32_spill] sm:$0xff] %v1697_v25  ;;  %v332_v5 = vmul.f32 %v324_v11, %v312_v57  ;;  %v341_v50 = vadd.f32 %v1695_v4, %v285_v26  ;;  %v342_v63 = vadd.f32 %v1697_v25, %v286_v62  ;;  %v343_v52 = vadd.f32 %v1699_v61, %v287_v43 }
  0x38   :  { %2905 = vst [vmem:[#allocation33_spill] sm:$0xff] %v1699_v61  ;;  %v333_v8 = vmul.f32 %v325_v13, %v313_v30  ;;  %v334_v37 = vmul.f32 %v326_v14, %v314_v16  ;;  %v335_v36 = vmul.f32 %v327_v12, %v315_v6  ;;  %v134_v22 = vrot.slane %v1348_v27, 2  ;;  %v2971_v61 = vld [vmem:[#allocation19_spill] sm:$0xff] }
  0x39   :  { %v135_v7 = vrot.slane %v1351_v28, 2  ;;  %v1728_v59 = vsel %vm1680_vm0, 0.0, %v332_v5  ;;  %v2913_v40 = vrot.slane %v2912_v39, 2  ;;  %v1753_v51 = vsub.f32 %v2915_v48, %v133_v42 }
  0x3a   :  { %v1732_v17 = vsel %vm1691_vm13, 0.0, %v333_v8  ;;  %v1736_v57 = vsel %vm1708_vm6, 0.0, %v334_v37  ;;  %v1738_v26 = vsel %vm247_vm7, 0.0, %v335_v36  ;;  %v344_v62 = vsub.f32 %v340_v29, %v1728_v59 }
  0x3b   :  { %2910 = vst [vmem:[#allocation34_spill] sm:$0xff] %v1736_v57  ;;  %v1742_v27 = vsub.f32 %v341_v50, %v1732_v17  ;;  %v1745_v28 = vsub.f32 %v342_v63, %v1736_v57  ;;  %v1750_v60 = vsub.f32 %v2914_v41, %v2913_v40  ;;  %v1756_v44 = vsub.f32 %v343_v52, %v1738_v26 }
  0x3c   :  { %2911 = vst [vmem:[#allocation35_spill] sm:$0xff] %v1738_v26  ;;  %1204 = vrcp.f32 %v344_v62  ;;  %v1759_v56 = vsub.f32 %v2916_v55, %v134_v22  ;;  %v1762_v9 = vsub.f32 %v2917_v38, %v135_v7  ;;  %v2918_v32 = vmov %v2913_v40  ;;  %v2928_v40 = vld [vmem:[#allocation25_spill] sm:$0xff]  ;;  %v2950_v26 = vld [vmem:[#allocation16_spill] sm:$0xff] }
  0x3d   :  { %v1767_v24 = vadd.f32 %v2918_v32, %v2914_v41  ;;  %1206 = vrcp.f32 %v1742_v27  ;;  %v361_v10 = vand.u32 2147483647, %v344_v62  ;;  %v363_v43 = vand.u32 2147483648, %v344_v62 }
  0x3e   :  { %v378_v30 = vand.u32 2147483648, %v1742_v27  ;;  %1208 = vrcp.f32 %v1745_v28  ;;  %v1773_v16 = vadd.f32 %v133_v42, %v2915_v48  ;;  %v1776_v23 = vadd.f32 %v134_v22, %v2916_v55  ;;  %v2980_v55 = vld [vmem:[#allocation27_spill] sm:$0xff] }
  0x3f   :  { %v1779_v18 = vadd.f32 %v135_v7, %v2917_v38  ;;  %v2835_v6 = vrot.slane %v1435_v46, 3  ;;  %v393_v0 = vand.u32 2147483648, %v1745_v28  ;;  %1210 = vrcp.f32 %v1756_v44 }
  0x40   :  { %v2840_v34 = vrot.slane %v1437_v47, 3  ;;  %vm357_vm12 = vweird.f32 %v344_v62  ;;  %vm372_vm3 = vweird.f32 %v1742_v27  ;;  %v376_v3 = vand.u32 2147483647, %v1742_v27 }
  0x41   :  { %vm1789_vm4 = vcmp.eq.f32.partialorder %v361_v10, 8.507059e+37  ;;  %v364_v14 = vor.u32 1.1754944e-38, %v363_v43  ;;  %v1793_v12 = vor.u32 1.1754944e-38, %v378_v30  ;;  %vm387_vm8 = vweird.f32 %v1745_v28 }
  0x42   :  { %v1205_v1 = vpop.eup %1204  ;;  %v391_v29 = vand.u32 2147483647, %v1745_v28  ;;  %vm402_vm9 = vweird.f32 %v1756_v44  ;;  %v406_v50 = vand.u32 2147483647, %v1756_v44  ;;  %v408_v63 = vand.u32 2147483648, %v1756_v44 }
  0x43   :  { %v1797_v42 = vpop.eup %1206  ;;  %v353_v5 = vmul.f32 %v1205_v1, %v344_v62  ;;  %v1806_v36 = vor.u32 1.1754944e-38, %v393_v0  ;;  %vm358_vm5 = vweird.f32 %v1205_v1  ;;  %vm1814_vm14 = vcmp.eq.f32.partialorder %v376_v3, 8.507059e+37 }
  0x44   :  { %v1802_v8 = vpop.eup %1208  ;;  %v368_v37 = vmul.f32 %v1797_v42, %v1742_v27  ;;  %vm373_vm10 = vweird.f32 %v1797_v42  ;;  %vm1819_vm15 = vcmp.eq.f32.partialorder %v391_v29, 8.507059e+37  ;;  %v2833_v32 = vrot.slane %v1443_v53, 3  ;;  %vm1826_vm13 = vmor %vm357_vm12, %vm358_vm5  ;;  %v2927_v29 = vld [vmem:[#allocation24_spill] sm:$0xff] }
  0x45   :  { %v354_v7 = vsub.f32 1.0, %v353_v5  ;;  %v383_v39 = vmul.f32 %v1802_v8, %v1745_v28  ;;  %v1211_v41 = vpop.eup %1210  ;;  %vm388_vm11 = vweird.f32 %v1802_v8  ;;  %v2832_v5 = vrot.slane %v1449_v21, 3  ;;  %vm1843_vm6 = vmor %vm372_vm3, %vm373_vm10  ;;  %v2942_v28 = vld [vmem:[#allocation20_spill] sm:$0xff] }
  0x46   :  { %v369_v48 = vsub.f32 1.0, %v368_v37  ;;  %v398_v30 = vmul.f32 %v1211_v41, %v1756_v44  ;;  %vm403_vm0 = vweird.f32 %v1211_v41  ;;  %v2831_v37 = vrot.slane %v2927_v29, 3  ;;  %vm1871_vm3 = vmor %vm387_vm8, %vm388_vm11 }
  0x47   :  { %v355_v10 = vmul.f32 %v1205_v1, %v354_v7  ;;  %v384_v43 = vsub.f32 1.0, %v383_v39  ;;  %v2834_v22 = vrot.slane %v2928_v40, 3  ;;  %vm464_vm1 = vcmp.lt.f32.partialorder %v1767_v24, %v2833_v32  ;;  %vm1879_vm5 = vmor %vm402_vm9, %vm403_vm0 }
  0x48   :  { %v370_v3 = vmul.f32 %v1797_v42, %v369_v48  ;;  %v399_v39 = vsub.f32 1.0, %v398_v30  ;;  %vm465_vm2 = vcmp.lt.f32.partialorder %v1773_v16, %v2832_v5  ;;  %vm1853_vm7 = vcmp.lt.f32.partialorder %v1776_v23, %v2831_v37 }
  0x49   :  { %v356_v11 = vadd.f32 %v1205_v1, %v355_v10  ;;  %v385_v7 = vmul.f32 %v1802_v8, %v384_v43  ;;  %vm1860_vm12 = vcmp.lt.f32.partialorder %v1779_v18, %v2834_v22  ;;  %v2937_v5 = vmov 0  }
  0x4a   :  { %v371_v62 = vadd.f32 %v1797_v42, %v370_v3  ;;  %v400_v37 = vmul.f32 %v1211_v41, %v399_v39  ;;  %v468_v32 = vsel %vm464_vm1, 1, %v2937_v5  ;;  %vm1883_vm10 = vcmp.eq.f32.partialorder %v406_v50, 8.507059e+37  ;;  %v2946_v50 = vld [vmem:[#allocation21_spill] sm:$0xff] }
  0x4b   :  { %v360_v43 = vsel %vm1826_vm13, %v1205_v1, %v356_v11  ;;  %v386_v30 = vadd.f32 %v1802_v8, %v385_v7  ;;  %v409_v1 = vor.u32 1.1754944e-38, %v408_v63  ;;  %vm1890_vm8 = vcmp.lt.f32.partialorder %v2942_v28, %v2835_v6  ;;  %v2945_v7 = vld [vmem:[#allocation26_spill] sm:$0xff]  ;;  %v2962_v3 = vld [vmem:[#allocation17_spill] sm:$0xff] }
  0x4c   :  { %v469_v44 = vsel %vm465_vm2, 1, %v2937_v5  ;;  %v365_v45 = vsel %vm1789_vm4, %v364_v14, %v360_v43  ;;  %v401_v52 = vadd.f32 %v1211_v41, %v400_v37  ;;  %vm1901_vm9 = vcmp.lt.f32.partialorder %v2946_v50, %v2840_v34  ;;  %v2954_v34 = vld [vmem:[#allocation22_spill] sm:$0xff] }
  0x4d   :  { %v2949_v6 = vrot.slane %v1445_v20, 3  ;;  %v470_v13 = vsel %vm1853_vm7, 1, %v2937_v5  ;;  %v375_v14 = vsel %vm1843_vm6, %v1797_v42, %v371_v62  ;;  %v390_v37 = vsel %vm1871_vm3, %v1802_v8, %v386_v30  ;;  %v2958_v62 = vld [vmem:[#allocation23_spill] sm:$0xff]  ;;  %v2332_v63 = vld [vmem:[%s2780_s1 + $0x8] sm:$0xff] }
  0x4e   :  { %v2953_v43 = vrot.slane %v1439_v49, 3  ;;  %v471_v10 = vsel %vm1860_vm12, 1, %v2937_v5  ;;  %v472_v39 = vrot.slane %v468_v32, 1  ;;  %v405_v48 = vsel %vm1879_vm5, %v1211_v41, %v401_v52  ;;  %v2966_v32 = vld [vmem:[#allocation18_spill] sm:$0xff] }
  0x4f   :  { %vm1908_vm11 = vcmp.gt.f32.partialorder %v2950_v26, %v2949_v6  ;;  %v2957_v42 = vrot.slane %v1441_v19, 3  ;;  %v2961_v30 = vrot.slane %v1447_v54, 3  ;;  %v2965_v27 = vrot.slane %v1455_v58, 3 }
  0x50   :  { %vm1924_vm4 = vcmp.lt.f32.partialorder %v2954_v34, %v2953_v43  ;;  %v473_v52 = vrot.slane %v469_v44, 1  ;;  %v1955_v41 = vmul.f32 %v365_v45, %v1728_v59  ;;  %v475_v4 = vrot.slane %v471_v10, 1 }
  0x51   :  { %vm1936_vm0 = vcmp.lt.f32.partialorder %v2958_v62, %v2957_v42  ;;  %vm1943_vm13 = vcmp.gt.f32.partialorder %v2962_v3, %v2961_v30  ;;  %vm1950_vm1 = vcmp.gt.f32.partialorder %v2966_v32, %v2965_v27  ;;  %v2970_v42 = vrot.slane %v2945_v7, 3 }
  0x52   :  { %2969 = vst [vmem:[#allocation10_spill] sm:$0xff] %v1955_v41  ;;  %v474_v30 = vrot.slane %v470_v13, 1  ;;  %v1967_v27 = vsel %vm1814_vm14, %v1793_v12, %v375_v14  ;;  %v1972_v44 = vsel %vm1819_vm15, %v1806_v36, %v390_v37  ;;  %v1976_v45 = vsel %vm1883_vm10, %v409_v1, %v405_v48  ;;  %v2981_v36 = vld [vmem:[#allocation28_spill] sm:$0xff]  ;;  %v2984_v1 = vld [vmem:[#allocation29_spill] sm:$0xff]  ;;  %v2985_v37 = vld [vmem:[#allocation30_spill] sm:$0xff] }
  0x53   :  { %vm1960_vm6 = vcmp.gt.f32.partialorder %v2971_v61, %v2970_v42  ;;  %vm1978_vm2 = vcmp.ne.s32.totalorder %v472_v39, 0  ;;  %vm1982_vm7 = vcmp.ne.s32.totalorder %v473_v52, 0  ;;  %v488_v38 = vrot.slane %v2980_v55, 3 }
  0x54   :  { %vm1986_vm12 = vcmp.ne.s32.totalorder %v474_v30, 0  ;;  %v489_v14 = vrot.slane %v2981_v36, 3  ;;  %vm1992_vm14 = vcmp.ne.s32.totalorder %v475_v4, 0  ;;  %v2982_v11 = vmov 0 }
  0x55   :  { %v2983_v11 = vsel %vm1992_vm14, 4294967295, %v2982_v11  ;;  %v490_v39 = vrot.slane %v2984_v1, 3  ;;  %v491_v10 = vrot.slane %v2985_v37, 3  ;;  %v2986_v48 = vrot.slane %v1435_v46, 3 }
  0x56   :  { %vm496_vm15 = vcmp.gt.f32.partialorder %v1750_v60, %v488_v38  ;;  %vm497_vm3 = vcmp.gt.f32.partialorder %v1753_v51, %v489_v14  ;;  %v2987_v30 = vrot.slane %v1437_v47, 3  ;;  %v2988_v55 = vrot.slane %v1439_v49, 3 }
  0x57   :  { %v2001_v52 = vmax.f32 %v2950_v26, %v2986_v48  ;;  %vm498_vm5 = vcmp.gt.f32.partialorder %v1759_v56, %v490_v39  ;;  %vm499_vm10 = vcmp.gt.f32.partialorder %v1762_v9, %v491_v10  ;;  %v500_v46 = vsel %vm496_vm15, 1, %v2937_v5 }
  0x58   :  { %v2008_v4 = vmax.f32 %v2962_v3, %v2987_v30  ;;  %v2013_v36 = vmax.f32 %v2966_v32, %v2988_v55  ;;  %v501_v26 = vsel %vm497_vm3, 1, %v2937_v5  ;;  %v502_v1 = vsel %vm498_vm5, 1, %v2937_v5 }
  0x59   :  { %v503_v47 = vsel %vm499_vm10, 1, %v2937_v5  ;;  %v504_v37 = vrot.slane %v500_v46, 1  ;;  %v505_v3 = vrot.slane %v501_v26, 1  ;;  %v506_v49 = vrot.slane %v502_v1, 1  ;;  %vm3006_vm10 = vmor %vm1890_vm8, %vm1908_vm11 }
  0x5a   :  { %v507_v32 = vrot.slane %v503_v47, 1  ;;  %v2989_v48 = vrot.slane %v1441_v19, 3  ;;  %v2990_v55 = vrot.slane %v1443_v53, 3  ;;  %v2995_v19 = vrot.slane %v1449_v21, 3  ;;  %vm3009_vm8 = vmor %vm1901_vm9, %vm1943_vm13  ;;  %v3024_v47 = vld [vmem:[#allocation35_spill] sm:$0xff] }
  0x5b   :  { %vm2035_vm3 = vcmp.ne.s32.totalorder %v504_v37, 0  ;;  %vm2039_vm5 = vcmp.ne.s32.totalorder %v505_v3, 0  ;;  %v2996_v53 = vrot.slane %v2927_v29, 3  ;;  %vm2053_vm15 = vcmp.ne.s32.totalorder %v506_v49, 0  ;;  %vm2104_vm11 = vmor %vm3009_vm8, %vm1982_vm7 }
  0x5c   :  { %v519_v30 = vmax.f32 %v2971_v61, %v2989_v48  ;;  %v520_v41 = vmax.f32 %v1750_v60, %v2990_v55  ;;  %v521_v61 = vmax.f32 %v1753_v51, %v2995_v19  ;;  %vm2057_vm14 = vcmp.ne.s32.totalorder %v507_v32, 0  ;;  %vm3012_vm9 = vmor %vm1924_vm4, %vm1950_vm1 }
  0x5d   :  { %v522_v1 = vmax.f32 %v1759_v56, %v2996_v53  ;;  %v2999_v37 = vmov 0  ;;  %v3001_v21 = vrot.slane %v2928_v40, 3  ;;  %v3002_v29 = vrot.slane %v1445_v20, 3  ;;  %vm2122_vm13 = vmor %vm3012_vm9, %vm1986_vm12 }
  0x5e   :  { %v3000_v37 = vsel %vm2057_vm14, 4294967295, %v2999_v37  ;;  %v3003_v49 = vrot.slane %v1447_v54, 3  ;;  %v3004_v55 = vrot.slane %v1455_v58, 3  ;;  %v3005_v40 = vrot.slane %v2945_v7, 3  ;;  %vm2088_vm14 = vmor %vm3006_vm10, %vm1978_vm2 }
  0x5f   :  { %v523_v3 = vmax.f32 %v1762_v9, %v3001_v21  ;;  %v524_v48 = vmin.f32 %v2942_v28, %v3002_v29  ;;  %v528_v20 = vmin.f32 %v1767_v24, %v488_v38  ;;  %v529_v58 = vmin.f32 %v1773_v16, %v489_v14  ;;  %vm3016_vm7 = vmor %vm1936_vm0, %vm1960_vm6 }
  0x60   :  { %v525_v32 = vmin.f32 %v2946_v50, %v3003_v49  ;;  %v526_v19 = vmin.f32 %v2954_v34, %v3004_v55  ;;  %v527_v53 = vmin.f32 %v2958_v62, %v3005_v40  ;;  %v530_v34 = vmin.f32 %v1776_v23, %v490_v39  ;;  %vm512_vm12 = vmor %vm2088_vm14, %vm2035_vm3 }
  0x61   :  { %v531_v28 = vmin.f32 %v1779_v18, %v491_v10  ;;  %v532_v7 = vsub.f32 %v1767_v24, %v1750_v60  ;;  %v533_v0 = vsub.f32 %v1773_v16, %v1753_v51  ;;  %v534_v50 = vsub.f32 %v1776_v23, %v1759_v56  ;;  %vm513_vm0 = vmor %vm2104_vm11, %vm2039_vm5 }
  0x62   :  { %v535_v60 = vsub.f32 %v1779_v18, %v1762_v9  ;;  %v552_v24 = vsub.f32 %v524_v48, %v2001_v52  ;;  %v553_v16 = vsub.f32 %v525_v32, %v2008_v4  ;;  %v554_v56 = vsub.f32 %v526_v19, %v2013_v36  ;;  %vm514_vm6 = vmor %vm2122_vm13, %vm2053_vm15  ;;  %v3022_v4 = vld [vmem:[#allocation33_spill] sm:$0xff]  ;;  %v3023_v19 = vld [vmem:[#allocation34_spill] sm:$0xff] }
  0x63   :  { %v540_v51 = vrot.slane %v532_v7, 1  ;;  %v555_v23 = vsub.f32 %v527_v53, %v519_v30  ;;  %vm3015_vm2 = vnez %v2983_v11  ;;  %v541_v18 = vrot.slane %v533_v0, 1 }
  0x64   :  { %vm2135_vm10 = vmor %vm3016_vm7, %vm3015_vm2  ;;  %v542_v6 = vrot.slane %v534_v50, 1  ;;  %v543_v62 = vrot.slane %v535_v60, 1  ;;  %v556_v43 = vsub.f32 %v528_v20, %v520_v41  ;;  %vm348_vm4 = vcmp.gt.f32.partialorder %v1728_v59, 0.0 }
  0x65   :  { %vm349_vm1 = vcmp.gt.f32.partialorder %v1732_v17, 0.0  ;;  %v548_v25 = vmul.f32 %v540_v51, %v1585_v2  ;;  %v557_v8 = vsub.f32 %v529_v58, %v521_v61  ;;  %v558_v22 = vsub.f32 %v530_v34, %v522_v1 }
  0x66   :  { %v559_v42 = vsub.f32 %v531_v28, %v523_v3  ;;  %v549_v41 = vmul.f32 %v541_v18, %v1605_v15  ;;  %v550_v13 = vmul.f32 %v542_v6, %v1609_v31  ;;  %v551_v12 = vmul.f32 %v543_v62, %v1613_v33  ;;  %v3020_v31 = vld [vmem:[#allocation31_spill] sm:$0xff]  ;;  %v3021_v33 = vld [vmem:[#allocation32_spill] sm:$0xff]  ;;  %v3025_v28 = vld [vmem:[#allocation10_spill] sm:$0xff] }
  0x67   :  { %v564_v38 = vrot.slane %v556_v43, 1  ;;  %v565_v2 = vrot.slane %v557_v8, 1  ;;  %v566_v14 = vrot.slane %v558_v22, 1  ;;  %v584_v39 = vrot.slane %v1671_v35, 3  ;;  %v3033_v22 = vld [vmem:[#allocation5_spill] sm:$0xff] }
  0x68   :  { %v567_v11 = vrot.slane %v559_v42, 1  ;;  %vm3019_vm8 = vnez %v3000_v37  ;;  %v585_v10 = vrot.slane %v3020_v31, 3  ;;  %v586_v52 = vrot.slane %v3021_v33, 3 }
  0x69   :  { %vm515_vm9 = vmor %vm2135_vm10, %vm3019_vm8  ;;  %v572_v15 = vmul.f32 %v564_v38, %v552_v24  ;;  %v587_v36 = vrot.slane %v3022_v4, 3  ;;  %v573_v30 = vmul.f32 %v565_v2, %v553_v16  ;;  %v574_v61 = vmul.f32 %v566_v14, %v554_v56  ;;  %v3037_v4 = vld [vmem:[#allocation8_spill] sm:$0xff] }
  0x6a   :  { %v575_v1 = vmul.f32 %v567_v11, %v555_v23  ;;  %v592_v21 = vadd.f32 %v584_v39, %v548_v25  ;;  %v593_v37 = vadd.f32 %v585_v10, %v549_v41  ;;  %v594_v3 = vadd.f32 %v586_v52, %v550_v13  ;;  %v3032_v25 = vld [vmem:[#allocation2_spill] sm:$0xff]  ;;  %v3035_v11 = vld [vmem:[#allocation7_spill] sm:$0xff] }
  0x6b   :  { %v2170_v35 = vsel %vm512_vm12, 0.0, %v572_v15  ;;  %v595_v29 = vadd.f32 %v587_v36, %v551_v12  ;;  %v2177_v48 = vsel %vm513_vm0, 0.0, %v573_v30  ;;  %v2184_v49 = vsel %vm514_vm6, 0.0, %v574_v61  ;;  %v3034_v12 = vld [vmem:[#allocation3_spill] sm:$0xff]  ;;  %v3036_v15 = vld [vmem:[#allocation4_spill] sm:$0xff] }
  0x6c   :  { %v2186_v46 = vsel %vm515_vm9, 0.0, %v575_v1  ;;  %v596_v32 = vsub.f32 %v592_v21, %v2170_v35  ;;  %v381_v55 = vmul.f32 %v1967_v27, %v1732_v17  ;;  %v396_v26 = vmul.f32 %v1972_v44, %v3023_v19  ;;  %v3042_v21 = vld [vmem:[#allocation6_spill] sm:$0xff] }
  0x6d   :  { %v2194_v40 = vsub.f32 %v593_v37, %v2177_v48  ;;  %v2197_v53 = vsub.f32 %v594_v3, %v2184_v49  ;;  %vm350_vm14 = vcmp.gt.f32.partialorder %v3023_v19, 0.0  ;;  %v411_v20 = vmul.f32 %v1976_v45, %v3024_v47  ;;  %v3043_v3 = vld [vmem:[#allocation9_spill] sm:$0xff] }
  0x6e   :  { %v2203_v54 = vsub.f32 %v595_v29, %v2186_v46  ;;  %1212 = vrcp.f32 %v596_v32  ;;  %vm351_vm15 = vcmp.gt.f32.partialorder %v3024_v47, 0.0  ;;  %v613_v27 = vand.u32 2147483647, %v596_v32 }
  0x6f   :  { %v615_v58 = vand.u32 2147483648, %v596_v32  ;;  %1214 = vrcp.f32 %v2194_v40  ;;  %v628_v44 = vand.u32 2147483647, %v2194_v40  ;;  %v630_v34 = vand.u32 2147483648, %v2194_v40 }
  0x70   :  { %1216 = vrcp.f32 %v2197_v53  ;;  %v2213_v45 = vsel %vm348_vm4, %v3025_v28, 0.0  ;;  %v2217_v7 = vsel %vm349_vm1, %v381_v55, 0.0  ;;  %v2219_v57 = vsel %vm350_vm14, %v396_v26, 0.0 }
  0x71   :  { %v643_v0 = vand.u32 2147483647, %v2197_v53  ;;  %v2222_v50 = vsel %vm351_vm15, %v411_v20, 0.0  ;;  %vm609_vm3 = vweird.f32 %v596_v32  ;;  %v645_v60 = vand.u32 2147483648, %v2197_v53 }
  0x72   :  { %1218 = vrcp.f32 %v2203_v54  ;;  %vm2226_vm5 = vcmp.eq.f32.partialorder %v613_v27, 8.507059e+37  ;;  %v616_v59 = vor.u32 1.1754944e-38, %v615_v58  ;;  %vm624_vm11 = vweird.f32 %v2194_v40 }
  0x73   :  { %vm639_vm13 = vweird.f32 %v2197_v53  ;;  %vm2232_vm2 = vcmp.eq.f32.partialorder %v628_v44, 8.507059e+37  ;;  %v631_v51 = vor.u32 1.1754944e-38, %v630_v34  ;;  %vm654_vm7 = vweird.f32 %v2203_v54  ;;  %v2289_v44 = vld [vmem:[%s2780_s1 + $0x20] sm:$0xff] }
  0x74   :  { %v1213_v17 = vpop.eup %1212  ;;  %v658_v16 = vand.u32 2147483647, %v2203_v54  ;;  %vm2238_vm10 = vcmp.eq.f32.partialorder %v643_v0, 8.507059e+37  ;;  %v646_v18 = vor.u32 1.1754944e-38, %v645_v60  ;;  %v660_v6 = vand.u32 2147483648, %v2203_v54  ;;  %v2299_v60 = vld [vmem:[%s2780_s1 + $0x28] sm:$0xff] }
  0x75   :  { %v1215_v56 = vpop.eup %1214  ;;  %v605_v23 = vmul.f32 %v1213_v17, %v596_v32  ;;  %vm704_vm4 = vcmask 1042432   ;;  %vm600_vm1 = vcmp.gt.f32.partialorder %v2170_v35, 0.0  ;;  %vm610_vm12 = vweird.f32 %v1213_v17 }
  0x76   :  { %v1217_v62 = vpop.eup %1216  ;;  %v620_v43 = vmul.f32 %v1215_v56, %v2194_v40  ;;  %v705_v8 = vrot.slane %v3032_v25, 5  ;;  %v706_v42 = vrot.slane %v3033_v22, 5  ;;  %vm601_vm0 = vcmp.gt.f32.partialorder %v2177_v48, 0.0  ;;  %vm2258_vm15 = vmor %vm609_vm3, %vm610_vm12 }
  0x77   :  { %v606_v41 = vsub.f32 1.0, %v605_v23  ;;  %vm625_vm6 = vweird.f32 %v1215_v56  ;;  %v635_v13 = vmul.f32 %v1217_v62, %v2197_v53  ;;  %v708_v38 = vrot.slane %v3034_v12, 5 }
  0x78   :  { %v1219_v2 = vpop.eup %1218  ;;  %v621_v14 = vsub.f32 1.0, %v620_v43  ;;  %vm640_vm9 = vweird.f32 %v1217_v62  ;;  %v709_v39 = vrot.slane %v3035_v11, 5  ;;  %v711_v31 = vrot.slane %v3036_v15, 5  ;;  %vm2271_vm14 = vmor %vm624_vm11, %vm625_vm6  ;;  %v3050_v43 = vld [vmem:[#allocation11_spill] sm:$0xff] }
  0x79   :  { %v607_v10 = vmul.f32 %v1213_v17, %v606_v41  ;;  %v636_v33 = vsub.f32 1.0, %v635_v13  ;;  %v650_v52 = vmul.f32 %v1219_v2, %v2203_v54  ;;  %v712_v36 = vrot.slane %v3037_v4, 5  ;;  %vm2278_vm12 = vmor %vm639_vm13, %vm640_vm9  ;;  %v2323_v54 = vld [vmem:[%s2780_s1 + $0x30] sm:$0xff] }
  0x7a   :  { %v622_v61 = vmul.f32 %v1215_v56, %v621_v14  ;;  %vm2262_vm8 = vcmp.eq.f32.partialorder %v658_v16, 8.507059e+37  ;;  %v714_v37 = vrot.slane %v3042_v21, 5  ;;  %v715_v29 = vrot.slane %v3043_v3, 5 }
  0x7b   :  { %v608_v55 = vadd.f32 %v1213_v17, %v607_v10  ;;  %v637_v32 = vmul.f32 %v1217_v62, %v636_v33  ;;  %v651_v26 = vsub.f32 1.0, %v650_v52  ;;  %vm655_vm3 = vweird.f32 %v1219_v2  ;;  %v2377_v52 = vld [vmem:[%s2780_s1 + $0x18] sm:$0xff]  ;;  %v27_v33 = vld [vmem:[%s2779_s0 + $0x50] sm:$0xff] }
  0x7c   :  { %v623_v47 = vadd.f32 %v1215_v56, %v622_v61  ;;  %v661_v27 = vor.u32 1.1754944e-38, %v660_v6  ;;  %v707_v58 = vsel %vm704_vm4, %v705_v8, %v706_v42  ;;  %v2284_v40 = vsel %vm704_vm4, %v708_v38, %v709_v39  ;;  %vm2307_vm11 = vmor %vm654_vm7, %vm655_vm3  ;;  %v2358_v39 = vld [vmem:[%s2780_s1 + $0x10] sm:$0xff]  ;;  %3054 = vst [vmem:[#allocation12_spill] sm:$0xff] %v2377_v52 }
  0x7d   :  { %v612_v34 = vsel %vm2258_vm15, %v1213_v17, %v608_v55  ;;  %v638_v28 = vadd.f32 %v1217_v62, %v637_v32  ;;  %v652_v53 = vmul.f32 %v1219_v2, %v651_v26  ;;  %v2294_v0 = vsel %vm704_vm4, %v711_v31, %v712_v36  ;;  %v28_v26 = vld [vmem:[%s2779_s0 + $0x58] sm:$0xff] }
  0x7e   :  { %v617_v16 = vsel %vm2226_vm5, %v616_v59, %v612_v34  ;;  %v627_v23 = vsel %vm2271_vm14, %v1215_v56, %v623_v47  ;;  %v2312_v6 = vsel %vm704_vm4, %v714_v37, %v715_v29  ;;  %v733_v25 = vrot.slane %v3050_v43, 5  ;;  %v2420_v34 = vld [vmem:[%s2779_s0] sm:$0xff]  ;;  %v2448_v43 = vld [vmem:[%s2779_s0 + $0x10] sm:$0xff] }
  0x7f   :  { %v618_v8 = vmul.f32 %v617_v16, %v2170_v35  ;;  %v632_v24 = vsel %vm2232_vm2, %v631_v51, %v627_v23  ;;  %v642_v59 = vsel %vm2278_vm12, %v1217_v62, %v638_v28  ;;  %v653_v56 = vadd.f32 %v1219_v2, %v652_v53  ;;  %v2338_v62 = vld [vmem:[%s2780_s1 + $0x38] sm:$0xff]  ;;  %v2428_v53 = vld [vmem:[%s2780_s1] sm:$0xff] }
  0x80   :  { %v633_v22 = vmul.f32 %v632_v24, %v2177_v48  ;;  %v647_v42 = vsel %vm2238_vm10, %v646_v18, %v642_v59  ;;  %v734_v41 = vrot.slane %v2289_v44, 5  ;;  %v736_v51 = vrot.slane %v2332_v63, 5 }
  0x81   :  { %v648_v13 = vmul.f32 %v647_v42, %v2184_v49  ;;  %v657_v9 = vsel %vm2307_vm11, %v1219_v2, %v653_v56  ;;  %v2345_v18 = vsel %vm600_vm1, %v618_v8, 0.0  ;;  %v737_v12 = vrot.slane %v2299_v60, 5 }
  0x82   :  { %v662_v38 = vsel %vm2262_vm8, %v661_v27, %v657_v9  ;;  %v2352_v14 = vsel %vm601_vm0, %v633_v22, 0.0  ;;  %v672_v11 = vrot.slane %v2345_v18, 5  ;;  %v739_v35 = vrot.slane %v2358_v39, 5 }
  0x83   :  { %v663_v2 = vmul.f32 %v662_v38, %v2186_v46  ;;  %vm3051_vm5 = vcmp.gt.f32.partialorder %v2184_v49, 0.0  ;;  %v673_v31 = vrot.slane %v2352_v14, 5  ;;  %v740_v48 = vrot.slane %v2323_v54, 5 }
  0x84   :  { %v2364_v15 = vsel %vm3051_vm5, %v648_v13, 0.0  ;;  %vm2370_vm13 = vcmp.ge.f32.partialorder %v2213_v45, %v672_v11  ;;  %v742_v49 = vrot.slane %v2377_v52, 5  ;;  %v743_v4 = vrot.slane %v2338_v62, 5 }
  0x85   :  { %v674_v10 = vrot.slane %v2364_v15, 5  ;;  %vm3055_vm2 = vcmp.gt.f32.partialorder %v2186_v46, 0.0  ;;  %vm2386_vm7 = vcmp.ge.f32.partialorder %v2217_v7, %v673_v31  ;;  %v684_v61 = vsel %vm2370_vm13, 1, %v2937_v5 }
  0x86   :  { %v2383_v36 = vsel %vm3055_vm2, %v663_v2, 0.0  ;;  %v735_v1 = vsel %vm704_vm4, %v733_v25, %v734_v41  ;;  %v685_v46 = vsel %vm2386_vm7, 1, %v2937_v5  ;;  %v688_v3 = vperm.slane %v684_v61, 0 }
  0x87   :  { %v675_v21 = vrot.slane %v2383_v36, 5  ;;  %vm2396_vm10 = vcmp.ge.f32.partialorder %v2219_v57, %v674_v10  ;;  %v689_v55 = vperm.slane %v685_v46, 0  ;;  %v738_v19 = vsel %vm704_vm4, %v736_v51, %v737_v12 }
  0x88   :  { %v686_v29 = vsel %vm2396_vm10, 1, %v2937_v5  ;;  %v741_v32 = vsel %vm704_vm4, %v739_v35, %v740_v48  ;;  %vm692_vm0 = vcmp.eq.s32.totalorder %v688_v3, 1  ;;  %v744_v20 = vsel %vm704_vm4, %v742_v49, %v743_v4 }
  0x89   :  { %vm2409_vm1 = vcmp.ge.f32.partialorder %v2222_v50, %v675_v21  ;;  %v690_v47 = vperm.slane %v686_v29, 0  ;;  %vm693_vm6 = vcmp.eq.s32.totalorder %v689_v55, 1  ;;  %v2423_v28 = vsel %vm692_vm0, %v2420_v34, %v707_v58 }
  0x8a   :  { %v687_v27 = vsel %vm2409_vm1, 1, %v2937_v5  ;;  %v2431_v16 = vsel %vm692_vm0, %v2428_v53, %v735_v1  ;;  %v2436_v5 = vld [vmem:[%s2779_s0 + $0x8] sm:$0xff]  ;;  %v2443_v58 = vsel %vm693_vm6, %v2332_v63, %v738_v19  ;;  %vm761_vm9 = vcmask 1041408  }
  0x8b   :  { %v691_v23 = vperm.slane %v687_v27, 0  ;;  %vm694_vm4 = vcmp.eq.s32.totalorder %v690_v47, 1  ;;  %v2440_v17 = vsel %vm693_vm6, %v2436_v5, %v2284_v40  ;;  %v753_v24 = vsub.f32 %v2423_v28, %v2431_v16 }
  0x8c   :  { %v2452_v25 = vsel %vm694_vm4, %v2448_v43, %v2294_v0  ;;  %v2455_v8 = vsel %vm694_vm4, %v2358_v39, %v741_v32  ;;  %v754_v40 = vsub.f32 %v2440_v17, %v2443_v58  ;;  %1220 = vrsqrt.f32 %v2423_v28  ;;  %v2467_v0 = vld [vmem:[%s2779_s0 + $0x18] sm:$0xff] }
  0x8d   :  { %vm695_vm8 = vcmp.eq.s32.totalorder %v691_v23, 1  ;;  %v755_v59 = vsub.f32 %v2452_v25, %v2455_v8  ;;  %v757_v42 = vmul.f32 %v753_v24, %v753_v24  ;;  %1222 = vrsqrt.f32 %v2440_v17 }
  0x8e   :  { %v2471_v56 = vsel %vm695_vm8, %v2467_v0, %v2312_v6  ;;  %v2474_v22 = vsel %vm695_vm8, %v2377_v52, %v744_v20  ;;  %v758_v41 = vmul.f32 %v754_v40, %v754_v40  ;;  %1224 = vrsqrt.f32 %v2452_v25 }
  0x8f   :  { %v756_v51 = vsub.f32 %v2471_v56, %v2474_v22  ;;  %v759_v13 = vmul.f32 %v755_v59, %v755_v59  ;;  %v762_v9 = vsel %vm761_vm9, %v757_v42, 0.0  ;;  %1226 = vrsqrt.f32 %v2471_v56 }
  0x90   :  { %v769_v12 = vsel %vm761_vm9, %v758_v41, 0.0  ;;  %v763_v11 = vrot.slane %v762_v9, 4  ;;  %vm797_vm14 = vcmp.eq.f32.partialorder %v2423_v28, inf  ;;  %v800_v47 = vand.u32 2147483648, %v2423_v28 }
  0x91   :  { %v760_v38 = vmul.f32 %v756_v51, %v756_v51  ;;  %v770_v35 = vrot.slane %v769_v12, 4  ;;  %v776_v6 = vsel %vm761_vm9, %v759_v13, 0.0  ;;  %vm799_vm15 = vcmp.eq.f32.partialorder %v2423_v28, 0.0 }
  0x92   :  { %v777_v2 = vrot.slane %v776_v6, 4  ;;  %v1221_v31 = vpop.eup %1220  ;;  %v764_v48 = vadd.f32 %v763_v11, %v762_v9  ;;  %vm809_vm3 = vcmp.eq.f32.partialorder %v2440_v17, inf  ;;  %v812_v41 = vand.u32 2147483648, %v2440_v17 }
  0x93   :  { %v771_v10 = vadd.f32 %v770_v35, %v769_v12  ;;  %v783_v49 = vsel %vm761_vm9, %v760_v38, 0.0  ;;  %v791_v1 = vmul.f32 %v1221_v31, %v2423_v28  ;;  %v1223_v3 = vpop.eup %1222  ;;  %vm811_vm12 = vcmp.eq.f32.partialorder %v2440_v17, 0.0 }
  0x94   :  { %v778_v4 = vadd.f32 %v777_v2, %v776_v6  ;;  %v784_v61 = vrot.slane %v783_v49, 4  ;;  %v765_v21 = vrot.slane %v764_v48, 2  ;;  %v803_v20 = vmul.f32 %v1223_v3, %v2440_v17  ;;  %v1225_v27 = vpop.eup %1224 }
  0x95   :  { %v772_v46 = vrot.slane %v771_v10, 2  ;;  %v792_v19 = vmul.f32 %v1221_v31, %v791_v1  ;;  %v815_v51 = vmul.f32 %v1225_v27, %v2452_v25  ;;  %vm821_vm11 = vcmp.eq.f32.partialorder %v2452_v25, inf  ;;  %v1227_v12 = vpop.eup %1226 }
  0x96   :  { %v779_v29 = vrot.slane %v778_v4, 2  ;;  %v785_v55 = vadd.f32 %v784_v61, %v783_v49  ;;  %v766_v32 = vadd.f32 %v765_v21, %v764_v48  ;;  %v804_v42 = vmul.f32 %v1223_v3, %v803_v20 }
  0x97   :  { %v773_v23 = vadd.f32 %v772_v46, %v771_v10  ;;  %v793_v59 = vmul.f32 0.5, %v792_v19  ;;  %1228 = vrsqrt.f32 %v2431_v16  ;;  %v816_v35 = vmul.f32 %v1225_v27, %v815_v51 }
  0x98   :  { %v780_v24 = vadd.f32 %v779_v29, %v778_v4  ;;  %v786_v40 = vrot.slane %v785_v55, 2  ;;  %v767_v38 = vrot.slane %v766_v32, 1  ;;  %v805_v11 = vmul.f32 0.5, %v804_v42 }
  0x99   :  { %v794_v9 = vsub.f32 1.5, %v793_v59  ;;  %vm823_vm5 = vcmp.eq.f32.partialorder %v2452_v25, 0.0  ;;  %v774_v6 = vrot.slane %v773_v23, 1  ;;  %v827_v10 = vmul.f32 %v1227_v12, %v2471_v56 }
  0x9a   :  { %v787_v13 = vadd.f32 %v786_v40, %v785_v55  ;;  %v781_v2 = vrot.slane %v780_v24, 1  ;;  %v806_v49 = vsub.f32 1.5, %v805_v11  ;;  %v817_v4 = vmul.f32 0.5, %v816_v35 }
  0x9b   :  { %v795_v48 = vmul.f32 %v1221_v31, %v794_v9  ;;  %v824_v61 = vand.u32 2147483648, %v2452_v25  ;;  %vm833_vm2 = vcmp.eq.f32.partialorder %v2471_v56, inf  ;;  %v828_v46 = vmul.f32 %v1227_v12, %v827_v10 }
  0x9c   :  { %v788_v1 = vrot.slane %v787_v13, 1  ;;  %vm835_vm0 = vcmp.eq.f32.partialorder %v2471_v56, 0.0  ;;  %v807_v29 = vmul.f32 %v1223_v3, %v806_v49  ;;  %v818_v55 = vsub.f32 1.5, %v817_v4 }
  0x9d   :  { %v796_v21 = vmul.f32 %v795_v48, %v2423_v28  ;;  %v836_v19 = vand.u32 2147483648, %v2471_v56  ;;  %1230 = vrsqrt.f32 %v2443_v58  ;;  %v1229_v31 = vpop.eup %1228  ;;  %v2504_v20 = vadd.f32 %v767_v38, %v766_v32 }
  0x9e   :  { %v2506_v40 = vadd.f32 %v774_v6, %v773_v23  ;;  %v2508_v59 = vadd.f32 %v781_v2, %v780_v24  ;;  %v829_v42 = vmul.f32 0.5, %v828_v46  ;;  %v808_v9 = vmul.f32 %v807_v29, %v2440_v17 }
  0x9f   :  { %v798_v51 = vsel %vm797_vm14, %v2423_v28, %v796_v21  ;;  %v819_v3 = vmul.f32 %v1225_v27, %v818_v55  ;;  %v839_v11 = vmul.f32 %v1229_v31, %v2431_v16  ;;  %v2515_v35 = vadd.f32 %v788_v1, %v787_v13 }
  0xa0   :  { %v830_v48 = vsub.f32 1.5, %v829_v42  ;;  %vm845_vm6 = vcmp.eq.f32.partialorder %v2431_v16, inf  ;;  %v848_v32 = vand.u32 2147483648, %v2431_v16  ;;  %1232 = vrsqrt.f32 %v2455_v8 }
  0xa1   :  { %v810_v23 = vsel %vm809_vm3, %v2440_v17, %v808_v9  ;;  %v820_v24 = vmul.f32 %v819_v3, %v2452_v25  ;;  %v840_v38 = vmul.f32 %v1229_v31, %v839_v11  ;;  %vm847_vm4 = vcmp.eq.f32.partialorder %v2431_v16, 0.0  ;;  %v2547_v17 = vld [vmem:[%s2779_s0 + $0x20] sm:$0xff] }
  0xa2   :  { %v860_v27 = vand.u32 2147483648, %v2443_v58  ;;  %v801_v13 = vsel %vm799_vm15, %v800_v47, %v798_v51  ;;  %v831_v6 = vmul.f32 %v1227_v12, %v830_v48  ;;  %v872_v2 = vand.u32 2147483648, %v2455_v8 }
  0xa3   :  { %1234 = vrsqrt.f32 %v2474_v22  ;;  %v1231_v10 = vpop.eup %1230  ;;  %v2532_v49 = vsel %vm811_vm12, %v812_v41, %v810_v23  ;;  %v822_v4 = vsel %vm821_vm11, %v2452_v25, %v820_v24  ;;  %v841_v1 = vmul.f32 0.5, %v840_v38 }
  0xa4   :  { %v884_v21 = vand.u32 2147483648, %v2474_v22  ;;  %v2540_v28 = vsel %vm823_vm5, %v824_v61, %v822_v4  ;;  %v832_v47 = vmul.f32 %v831_v6, %v2471_v56  ;;  %v851_v12 = vmul.f32 %v1231_v10, %v2443_v58 }
  0xa5   :  { %v2551_v41 = vsub.f32 %v2547_v17, %v2289_v44  ;;  %v842_v46 = vsub.f32 1.5, %v841_v1  ;;  %vm857_vm8 = vcmp.eq.f32.partialorder %v2443_v58, inf  ;;  %v946_v25 = vrot.slane %v2213_v45, 4 }
  0xa6   :  { %v947_v61 = vrot.slane %v2217_v7, 4  ;;  %v948_v29 = vrot.slane %v2219_v57, 4  ;;  %v1233_v55 = vpop.eup %1232  ;;  %v834_v42 = vsel %vm833_vm2, %v2471_v56, %v832_v47  ;;  %v852_v51 = vmul.f32 %v1231_v10, %v851_v12 }
  0xa7   :  { %vm859_vm14 = vcmp.eq.f32.partialorder %v2443_v58, 0.0  ;;  %v949_v44 = vrot.slane %v2222_v50, 4  ;;  %v962_v9 = vrot.slane %v2345_v18, 4  ;;  %v2565_v3 = vsel %vm835_vm0, %v836_v19, %v834_v42 }
  0xa8   :  { %v843_v45 = vmul.f32 %v1229_v31, %v842_v46  ;;  %v863_v7 = vmul.f32 %v1233_v55, %v2455_v8  ;;  %v954_v57 = vsub.f32 %v2420_v34, %v946_v25  ;;  %v853_v48 = vmul.f32 0.5, %v852_v51 }
  0xa9   :  { %v1235_v11 = vpop.eup %1234  ;;  %vm869_vm15 = vcmp.eq.f32.partialorder %v2455_v8, inf  ;;  %v955_v23 = vsub.f32 %v2436_v5, %v947_v61  ;;  %v956_v24 = vsub.f32 %v2448_v43, %v948_v29  ;;  %v957_v50 = vsub.f32 %v2467_v0, %v949_v44 }
  0xaa   :  { %v844_v18 = vmul.f32 %v843_v45, %v2431_v16  ;;  %v864_v56 = vmul.f32 %v1233_v55, %v863_v7  ;;  %vm871_vm3 = vcmp.eq.f32.partialorder %v2455_v8, 0.0  ;;  %v875_v19 = vmul.f32 %v1235_v11, %v2474_v22 }
  0xab   :  { %v2576_v31 = vmul.f32 %v954_v57, %v954_v57  ;;  %v854_v38 = vsub.f32 1.5, %v853_v48  ;;  %vm881_vm12 = vcmp.eq.f32.partialorder %v2474_v22, inf  ;;  %v2579_v6 = vmul.f32 %v955_v23, %v955_v23  ;;  %v2599_v23 = vld [vmem:[%s2779_s0 + $0x28] sm:$0xff] }
  0xac   :  { %v2581_v4 = vmul.f32 %v956_v24, %v956_v24  ;;  %v2583_v1 = vmul.f32 %v957_v50, %v957_v50  ;;  %v846_v47 = vsel %vm845_vm6, %v2431_v16, %v844_v18  ;;  %v865_v12 = vmul.f32 0.5, %v864_v56  ;;  %v2611_v16 = vld [vmem:[%s2779_s0 + $0x38] sm:$0xff] }
  0xad   :  { %v876_v46 = vmul.f32 %v1235_v11, %v875_v19  ;;  %vm883_vm11 = vcmp.eq.f32.partialorder %v2474_v22, 0.0  ;;  %v963_v25 = vrot.slane %v2352_v14, 4  ;;  %v849_v61 = vsel %vm847_vm4, %v848_v32, %v846_v47 }
  0xae   :  { %v855_v29 = vmul.f32 %v1231_v10, %v854_v38  ;;  %v964_v42 = vrot.slane %v2364_v15, 4  ;;  %v965_v51 = vrot.slane %v2383_v36, 4  ;;  %v866_v44 = vsub.f32 1.5, %v865_v12  ;;  %v2605_v15 = vld [vmem:[%s2779_s0 + $0x30] sm:$0xff] }
  0xaf   :  { %v877_v45 = vmul.f32 0.5, %v876_v46  ;;  %v886_v7 = vsub.f32 %v801_v13, %v849_v61  ;;  %v970_v57 = vsub.f32 %v2547_v17, %v962_v9  ;;  %v971_v14 = vsub.f32 %v2599_v23, %v963_v25 }
  0xb0   :  { %v856_v48 = vmul.f32 %v855_v29, %v2443_v58  ;;  %v972_v36 = vsub.f32 %v2605_v15, %v964_v42  ;;  %v973_v32 = vsub.f32 %v2611_v16, %v965_v51  ;;  %v867_v13 = vmul.f32 %v1233_v55, %v866_v44 }
  0xb1   :  { %v878_v10 = vsub.f32 1.5, %v877_v45  ;;  %v890_v9 = vmul.f32 %v886_v7, %v886_v7  ;;  %v974_v24 = vmul.f32 %v970_v57, %v970_v57  ;;  %v975_v18 = vmul.f32 %v971_v14, %v971_v14 }
  0xb2   :  { %v858_v50 = vsel %vm857_vm8, %v2443_v58, %v856_v48  ;;  %v976_v56 = vmul.f32 %v972_v36, %v972_v36  ;;  %v977_v19 = vmul.f32 %v973_v32, %v973_v32  ;;  %v868_v47 = vmul.f32 %v867_v13, %v2455_v8 }
  0xb3   :  { %v861_v38 = vsel %vm859_vm14, %v860_v27, %v858_v50  ;;  %v879_v12 = vmul.f32 %v1235_v11, %v878_v10  ;;  %v898_v46 = vrot.slane %v890_v9, 2  ;;  %v982_v25 = vrot.slane %v2576_v31, 4 }
  0xb4   :  { %v887_v55 = vsub.f32 %v2532_v49, %v861_v38  ;;  %v983_v61 = vrot.slane %v2579_v6, 4  ;;  %v984_v29 = vrot.slane %v2581_v4, 4  ;;  %v870_v42 = vsel %vm869_vm15, %v2455_v8, %v868_v47  ;;  %v25_v38 = vld [vmem:[%s2779_s0 + $0x40] sm:$0xff]  ;;  %v26_v47 = vld [vmem:[%s2779_s0 + $0x48] sm:$0xff] }
  0xb5   :  { %v880_v51 = vmul.f32 %v879_v12, %v2474_v22  ;;  %v906_v58 = vsel %vm761_vm9, %v898_v46, 0.0  ;;  %v985_v27 = vrot.slane %v2583_v1, 4  ;;  %v873_v49 = vsel %vm871_vm3, %v872_v2, %v870_v42 }
  0xb6   :  { %v891_v11 = vmul.f32 %v887_v55, %v887_v55  ;;  %v907_v31 = vrot.slane %v906_v58, 4  ;;  %v994_v6 = vrot.slane %v974_v24, 1  ;;  %v888_v44 = vsub.f32 %v2540_v28, %v873_v49  ;;  %v41_v55 = vld [vmem:[%s2780_s1 + $0x40] sm:$0xff]  ;;  %v43_v49 = vld [vmem:[%s2780_s1 + $0x50] sm:$0xff] }
  0xb7   :  { %v882_v4 = vsel %vm881_vm12, %v2474_v22, %v880_v51  ;;  %v995_v45 = vrot.slane %v975_v18, 1  ;;  %v996_v7 = vrot.slane %v976_v56, 1  ;;  %v997_v8 = vrot.slane %v977_v19, 1 }
  0xb8   :  { %v885_v1 = vsel %vm883_vm11, %v884_v21, %v882_v4  ;;  %v899_v57 = vrot.slane %v891_v11, 2  ;;  %v908_v48 = vadd.f32 %v907_v31, %v906_v58  ;;  %v892_v14 = vmul.f32 %v888_v44, %v888_v44  ;;  %v29_v58 = vld [vmem:[%s2779_s0 + $0x60] sm:$0xff]  ;;  %v44_v44 = vld [vmem:[%s2780_s1 + $0x58] sm:$0xff] }
  0xb9   :  { %v889_v2 = vsub.f32 %v2565_v3, %v885_v1  ;;  %v2647_v36 = vsel %vm2370_vm13, %v982_v25, %v994_v6  ;;  %v2651_v28 = vsel %vm2386_vm7, %v983_v61, %v995_v45  ;;  %v2656_v22 = vsel %vm2396_vm10, %v984_v29, %v996_v7 }
  0xba   :  { %v909_v32 = vrot.slane %v908_v48, 2  ;;  %v913_v13 = vsel %vm761_vm9, %v899_v57, 0.0  ;;  %v2660_v21 = vsel %vm2409_vm1, %v985_v27, %v997_v8  ;;  %v900_v10 = vrot.slane %v892_v14, 2 }
  0xbb   :  { %v893_v3 = vmul.f32 %v889_v2, %v889_v2  ;;  %v914_v9 = vrot.slane %v913_v13, 4  ;;  %v1006_v24 = vsel %vm2370_vm13, %v994_v6, %v982_v25  ;;  %v1007_v18 = vsel %vm2386_vm7, %v995_v45, %v983_v61  ;;  %v42_v25 = vld [vmem:[%s2780_s1 + $0x48] sm:$0xff]  ;;  %v45_v45 = vld [vmem:[%s2780_s1 + $0x60] sm:$0xff]  ;;  %v47_v2 = vld [vmem:[%s2780_s1 + $0x70] sm:$0xff] }
  0xbc   :  { %v910_v50 = vadd.f32 %v909_v32, %v908_v48  ;;  %v1008_v56 = vsel %vm2396_vm10, %v996_v7, %v984_v29  ;;  %v1009_v19 = vsel %vm2409_vm1, %v997_v8, %v985_v27  ;;  %v920_v37 = vsel %vm761_vm9, %v900_v10, 0.0  ;;  %v30_v27 = vld [vmem:[%s2779_s0 + $0x68] sm:$0xff]  ;;  %v32_v10 = vld [vmem:[%s2779_s0 + $0x78] sm:$0xff] }
  0xbd   :  { %v901_v30 = vrot.slane %v893_v3, 2  ;;  %v915_v12 = vadd.f32 %v914_v9, %v913_v13  ;;  %v2680_v46 = vmul.f32 0.5, %v1006_v24  ;;  %v921_v29 = vrot.slane %v920_v37, 4  ;;  %v46_v7 = vld [vmem:[%s2780_s1 + $0x68] sm:$0xff] }
  0xbe   :  { %v911_v61 = vrot.slane %v910_v50, 1  ;;  %v2691_v42 = vmul.f32 0.5, %v1007_v18  ;;  %v2693_v51 = vmul.f32 0.5, %v1008_v56  ;;  %v2705_v6 = vmul.f32 0.5, %v1009_v19 }
  0xbf   :  { %v916_v11 = vrot.slane %v915_v12, 2  ;;  %v927_v31 = vsel %vm761_vm9, %v901_v30, 0.0  ;;  %v1015_v4 = vsub.f32 %v2599_v23, %v2299_v60  ;;  %v922_v57 = vadd.f32 %v921_v29, %v920_v37  ;;  %v31_v60 = vld [vmem:[%s2779_s0 + $0x70] sm:$0xff] }
  0xc0   :  { %v912_v1 = vadd.f32 %v911_v61, %v910_v50  ;;  %v928_v48 = vrot.slane %v927_v31, 4  ;;  %v1016_v8 = vsub.f32 %v2605_v15, %v2323_v54  ;;  %v1017_v32 = vsub.f32 %v2611_v16, %v2338_v62  ;;  %v48_v54 = vld [vmem:[%s2780_s1 + $0x78] sm:$0xff] }
  0xc1   :  { %v917_v14 = vadd.f32 %v916_v11, %v915_v12  ;;  %v1018_v13 = vsub.f32 %v25_v38, %v41_v55  ;;  %v1019_v3 = vsub.f32 %v26_v47, %v42_v25  ;;  %v923_v9 = vrot.slane %v922_v57, 2 }
  0xc2   :  { %v929_v24 = vadd.f32 %v928_v48, %v927_v31  ;;  %v934_v50 = vadd.f32 %v912_v1, %v2504_v20  ;;  %v1020_v18 = vsub.f32 %v27_v33, %v43_v49  ;;  %v1021_v19 = vsub.f32 %v28_v26, %v44_v44 }
  0xc3   :  { %v918_v56 = vrot.slane %v917_v14, 1  ;;  %v1022_v30 = vsub.f32 %v29_v58, %v45_v45  ;;  %v1023_v12 = vsub.f32 %v30_v27, %v46_v7  ;;  %v924_v62 = vadd.f32 %v923_v9, %v922_v57 }
  0xc4   :  { %v930_v38 = vrot.slane %v929_v24, 2  ;;  %v938_v47 = vmul.f32 5.0, %v934_v50  ;;  %v1024_v37 = vsub.f32 %v31_v60, %v47_v2  ;;  %v1025_v25 = vsub.f32 %v32_v10, %v48_v54 }
  0xc5   :  { %v919_v55 = vadd.f32 %v918_v56, %v917_v14  ;;  %v1026_v61 = vmul.f32 %v2551_v41, %v2551_v41  ;;  %v1027_v29 = vmul.f32 %v1015_v4, %v1015_v4  ;;  %v925_v11 = vrot.slane %v924_v62, 1 }
  0xc6   :  { %v931_v52 = vadd.f32 %v930_v38, %v929_v24  ;;  %v1028_v31 = vmul.f32 %v1016_v8, %v1016_v8  ;;  %v1029_v48 = vmul.f32 %v1017_v32, %v1017_v32  ;;  %v1030_v33 = vmul.f32 %v1018_v13, %v1018_v13 }
  0xc7   :  { %v935_v20 = vadd.f32 %v919_v55, %v2506_v40  ;;  %v1031_v26 = vmul.f32 %v1019_v3, %v1019_v3  ;;  %v1032_v58 = vmul.f32 %v1020_v18, %v1020_v18  ;;  %v926_v27 = vadd.f32 %v925_v11, %v924_v62 }
  0xc8   :  { %v932_v49 = vrot.slane %v931_v52, 1  ;;  %v1033_v44 = vmul.f32 %v1021_v19, %v1021_v19  ;;  %v1034_v45 = vmul.f32 %v1022_v30, %v1022_v30  ;;  %v1035_v1 = vmul.f32 %v1023_v12, %v1023_v12 }
  0xc9   :  { %v939_v7 = vmul.f32 5.0, %v935_v20  ;;  %v1036_v57 = vmul.f32 %v1024_v37, %v1024_v37  ;;  %v1037_v60 = vmul.f32 %v1025_v25, %v1025_v25  ;;  %v936_v41 = vadd.f32 %v926_v27, %v2508_v59 }
  0xca   :  { %v933_v2 = vadd.f32 %v932_v49, %v931_v52  ;;  %vm1050_vm13 = vcmask 1045504   ;;  %v1051_v4 = vrot.slane %v1026_v61, 2  ;;  %v1052_v8 = vrot.slane %v1030_v33, 2 }
  0xcb   :  { %v1054_v14 = vrot.slane %v1027_v29, 2  ;;  %v1055_v32 = vrot.slane %v1031_v26, 2  ;;  %v1057_v40 = vrot.slane %v1028_v31, 2  ;;  %v940_v3 = vmul.f32 5.0, %v936_v41 }
  0xcc   :  { %v937_v13 = vadd.f32 %v933_v2, %v2515_v35  ;;  %v1058_v10 = vrot.slane %v1032_v58, 2  ;;  %v1060_v54 = vrot.slane %v1029_v48, 2  ;;  %v1053_v9 = vsel %vm1050_vm13, %v1051_v4, %v1052_v8 }
  0xcd   :  { %v1056_v24 = vsel %vm1050_vm13, %v1054_v14, %v1055_v32  ;;  %v1061_v50 = vrot.slane %v1033_v44, 2  ;;  %v1063_v18 = vrot.slane %v1034_v45, 2  ;;  %v1065_v56 = vrot.slane %v1035_v1, 2 }
  0xce   :  { %v941_v52 = vmul.f32 5.0, %v937_v13  ;;  %v1059_v59 = vsel %vm1050_vm13, %v1057_v40, %v1058_v10  ;;  %v1067_v19 = vrot.slane %v1036_v57, 2  ;;  %v1069_v62 = vrot.slane %v1037_v60, 2 }
  0xcf   :  { %v1062_v30 = vsel %vm1050_vm13, %v1060_v54, %v1061_v50  ;;  %v1064_v12 = vsel %vm1050_vm13, %v1052_v8, %v1063_v18  ;;  %vm1084_vm7 = vcmask 1043456   ;;  %v1066_v35 = vsel %vm1050_vm13, %v1055_v32, %v1065_v56 }
  0xd0   :  { %v1068_v38 = vsel %vm1050_vm13, %v1058_v10, %v1067_v19  ;;  %v1083_v37 = vadd.f32 %v1064_v12, %v1053_v9  ;;  %v1085_v55 = vsel %vm1084_vm7, %v1063_v18, 0.0  ;;  %v1070_v25 = vsel %vm1050_vm13, %v1061_v50, %v1069_v62 }
  0xd1   :  { %v1093_v61 = vadd.f32 %v1066_v35, %v1056_v24  ;;  %v1094_v29 = vsel %vm1084_vm7, %v1065_v56, 0.0  ;;  %v1102_v11 = vadd.f32 %v1068_v38, %v1059_v59  ;;  %v1103_v48 = vsel %vm1084_vm7, %v1067_v19, 0.0 }
  0xd2   :  { %v1086_v31 = vadd.f32 %v1085_v55, %v1083_v37  ;;  %v1111_v20 = vadd.f32 %v1070_v25, %v1062_v30  ;;  %v1112_v33 = vsel %vm1084_vm7, %v1069_v62, 0.0  ;;  %v1120_v27 = vadd.f32 %v2647_v36, %v938_v47 }
  0xd3   :  { %v1095_v26 = vadd.f32 %v1094_v29, %v1093_v61  ;;  %v1104_v58 = vadd.f32 %v1103_v48, %v1102_v11  ;;  %v1121_v49 = vadd.f32 %v2651_v28, %v939_v7  ;;  %v1122_v1 = vadd.f32 %v2656_v22, %v940_v3 }
  0xd4   :  { %v1087_v44 = vrot.slane %v1086_v31, 4  ;;  %v1113_v45 = vadd.f32 %v1112_v33, %v1111_v20  ;;  %v1123_v57 = vadd.f32 %v2660_v21, %v941_v52  ;;  %v1124_v41 = vadd.f32 %v1120_v27, %v2680_v46  ;;  %v3062_v33 = vld [vmem:[#allocation12_spill] sm:$0xff] }
  0xd5   :  { %v1096_v60 = vrot.slane %v1095_v26, 4  ;;  %v1105_v2 = vrot.slane %v1104_v58, 4  ;;  %v1125_v4 = vadd.f32 %v1121_v49, %v2691_v42  ;;  %v1126_v32 = vadd.f32 %v1122_v1, %v2693_v51 }
  0xd6   :  { %v1088_v8 = vadd.f32 %v1087_v44, %v1086_v31  ;;  %v1114_v14 = vrot.slane %v1113_v45, 4  ;;  %v1127_v36 = vadd.f32 %v1123_v57, %v2705_v6  ;;  %v1132_v7 = vmul.f32 %v2420_v34, %v2420_v34 }
  0xd7   :  { %v1097_v47 = vadd.f32 %v1096_v60, %v1095_v26  ;;  %v1106_v28 = vadd.f32 %v1105_v2, %v1104_v58  ;;  %v1133_v22 = vmul.f32 %v2436_v5, %v2436_v5  ;;  %v1134_v46 = vmul.f32 %v2448_v43, %v2448_v43 }
  0xd8   :  { %v1089_v21 = vrot.slane %v1088_v8, 2  ;;  %v1115_v40 = vadd.f32 %v1114_v14, %v1113_v45  ;;  %v1135_v42 = vmul.f32 %v2467_v0, %v2467_v0  ;;  %v1136_v6 = vmul.f32 %v2547_v17, %v2547_v17 }
  0xd9   :  { %v1098_v13 = vrot.slane %v1097_v47, 2  ;;  %v1107_v51 = vrot.slane %v1106_v28, 2  ;;  %v1137_v3 = vmul.f32 %v2599_v23, %v2599_v23  ;;  %v1138_v5 = vmul.f32 %v2605_v15, %v2605_v15 }
  0xda   :  { %v1090_v34 = vadd.f32 %v1089_v21, %v1088_v8  ;;  %v1116_v10 = vrot.slane %v1115_v40, 2  ;;  %v1139_v54 = vmul.f32 %v2611_v16, %v2611_v16  ;;  %v1144_v24 = vrot.slane %v1136_v6, 5 }
  0xdb   :  { %v1099_v43 = vadd.f32 %v1098_v13, %v1097_v47  ;;  %v1108_v9 = vadd.f32 %v1107_v51, %v1106_v28  ;;  %v1145_v0 = vrot.slane %v1137_v3, 5  ;;  %v1146_v52 = vrot.slane %v1138_v5, 5 }
  0xdc   :  { %v1091_v50 = vrot.slane %v1090_v34, 1  ;;  %v1117_v18 = vadd.f32 %v1116_v10, %v1115_v40  ;;  %v1147_v59 = vrot.slane %v1139_v54, 5  ;;  %v1152_v19 = vadd.f32 %v1144_v24, %v1132_v7 }
  0xdd   :  { %v1100_v17 = vrot.slane %v1099_v43, 1  ;;  %v1109_v56 = vrot.slane %v1108_v9, 1  ;;  %v1153_v23 = vadd.f32 %v1145_v0, %v1133_v22  ;;  %v1154_v62 = vadd.f32 %v1146_v52, %v1134_v46 }
  0xde   :  { %v1092_v30 = vadd.f32 %v1091_v50, %v1090_v34  ;;  %v1118_v12 = vrot.slane %v1117_v18, 1  ;;  %v1155_v35 = vadd.f32 %v1147_v59, %v1135_v42  ;;  %v1156_v37 = vmul.f32 0.5, %v1152_v19 }
  0xdf   :  { %v1101_v15 = vadd.f32 %v1100_v17, %v1099_v43  ;;  %v1110_v38 = vadd.f32 %v1109_v56, %v1108_v9  ;;  %v1157_v25 = vmul.f32 0.5, %v1153_v23  ;;  %v1158_v61 = vmul.f32 0.5, %v1154_v62 }
  0xe0   :  { %v1119_v16 = vadd.f32 %v1118_v12, %v1117_v18  ;;  %v1128_v55 = vadd.f32 %v1124_v41, %v1092_v30  ;;  %v1159_v31 = vmul.f32 0.5, %v1155_v35  ;;  %vm1160_vm10 = vcmp.eq.f32.partialorder %v2428_v53, 1.0 }
  0xe1   :  { %v1129_v29 = vadd.f32 %v1125_v4, %v1101_v15  ;;  %v1130_v11 = vadd.f32 %v1126_v32, %v1110_v38  ;;  %vm1161_vm1 = vcmp.eq.f32.partialorder %v2332_v63, 1.0  ;;  %vm1162_vm9 = vcmp.eq.f32.partialorder %v2358_v39, 1.0 }
  0xe2   :  { %v1131_v48 = vadd.f32 %v1127_v36, %v1119_v16  ;;  %v1168_v20 = vrot.slane %v1128_v55, 4  ;;  %vm1163_vm5 = vcmp.eq.f32.partialorder %v3062_v33, 1.0  ;;  %v1191_v53 = vlaneseq }
  0xe3   :  { %v1169_v26 = vrot.slane %v1129_v29, 4  ;;  %v1170_v58 = vrot.slane %v1130_v11, 4 }
  0xe4   :  { %v1171_v27 = vrot.slane %v1131_v48, 4  ;;  %v1176_v49 = vsel %vm1160_vm10, %v1168_v20, %v1156_v37  ;;  %vm1193_vm2 = vcmp.lt.s32.totalorder %v1191_v53, 512 }
  0xe5   :  { %v1177_v44 = vsel %vm1161_vm1, %v1169_v26, %v1157_v25  ;;  %v1178_v45 = vsel %vm1162_vm9, %v1170_v58, %v1158_v61  ;;  %1184 = vst [vmem:[#allocation1] sm:$0xff] %v1176_v49 }
  0xe6   :  { %v1179_v1 = vsel %vm1163_vm5, %v1171_v27, %v1159_v31  ;;  %1185 = vst [vmem:[#allocation1 + $0x9] sm:$0xff] %v1177_v44 }
  0xe7   :  { %1186 = vst [vmem:[#allocation1 + $0x12] sm:$0xff] %v1178_v45 }
  0xe8   :  { %1187 = vst [vmem:[#allocation1 + $0x1b] sm:$0xff] %v1179_v1 }
  0xef   :  { %v1189_v57 = vld [vmem:[#allocation1 + $0x4] ss:$9 sm:$0xff] }
  0xf0   :  { %1195 = vst.msk [vmem:[%s2783_s4] sm:$0xf] %vm1193_vm2, %v1189_v57 }

</bundles_post_ra>
